<compile_context>
chip_gen: v6e
topology: v6e:2x2x1
jax: 0.10.0
libtpu: 0.0.40
codegen_flags: <defaults>
</compile_context>

<pallas_src>
import math

import jax
import jax.numpy as jnp
from jax.experimental import pallas as pl
from jax.experimental.pallas import tpu as pltpu

_LANE = 128
_SUBLANE = 8


def _round_up(x, m):
    return ((x + m - 1) // m) * m


def _pad2(a, rows, cols):
    """Zero-pad a 2-D array up to (rows, cols)."""
    out = jnp.zeros((rows, cols), a.dtype)
    return out.at[: a.shape[0], : a.shape[1]].set(a)


def _make_fused_kernel(num_linear, eps=1e-5):
    """Fused (Linear [+ReLU])*L + LayerNorm over one row-tile of one network.

    Ref order: out_dims(SMEM), x, w0, b0, ..., w_{L-1}, b_{L-1}, gamma, beta, out.
    All feature dims are zero-padded to multiples of 128; LayerNorm statistics
    use only the first out_dims[g] (real) features of the padded output.
    """

    def kernel(out_dims_ref, x_ref, *refs):
        out_ref = refs[-1]
        gamma = refs[-3][0].astype(jnp.float32)   # (1, out_pad)
        beta = refs[-2][0].astype(jnp.float32)    # (1, out_pad)

        g = pl.program_id(0)                      # 0 = node net, 1 = edge net
        out_real = out_dims_ref[g]                # real LayerNorm width

        h = x_ref[0].astype(jnp.float32)          # (tile_m, in_pad)
        for i in range(num_linear):
            w = refs[2 * i][0].astype(jnp.float32)       # (d_in_pad, d_out_pad)
            b = refs[2 * i + 1][0].astype(jnp.float32)   # (1, d_out_pad)
            h = jnp.dot(h, w, preferred_element_type=jnp.float32) + b
            if i < num_linear - 1:
                h = jnp.maximum(h, 0.0)           # ReLU

        # Masked LayerNorm over the real feature width (pad lanes excluded).
        col = jax.lax.broadcasted_iota(jnp.int32, h.shape, 1)
        valid = (col < out_real).astype(jnp.float32)
        inv_d = 1.0 / out_real.astype(jnp.float32)
        mean = jnp.sum(h * valid, axis=-1, keepdims=True) * inv_d
        cent = (h - mean) * valid
        var = jnp.sum(cent * cent, axis=-1, keepdims=True) * inv_d
        y = cent * jax.lax.rsqrt(var + eps)
        y = y * gamma + beta                      # pad lanes: gamma=beta=0 -> 0
        out_ref[0] = y.astype(out_ref.dtype)      # lane-dense (out_pad=128k) store

    return kernel


def _fused_encoder_call(xs, w_stack, b_stack, gamma, beta, out_dims,
                        num_linear, tile_m, out_pad):
    """Single pallas_call running both networks: grid = (2, row_tiles)."""
    _, r_pad, in_pad = xs.shape
    grid = (2, r_pad // tile_m)

    kernel = _make_fused_kernel(num_linear)

    # Index maps receive the scalar-prefetch ref as a trailing positional arg.
    in_specs = [pl.BlockSpec((1, tile_m, in_pad), lambda g, i, od: (g, i, 0))]
    args = [xs]
    for w, b in zip(w_stack, b_stack):
        in_specs.append(pl.BlockSpec((1, w.shape[1], w.shape[2]),
                                     lambda g, i, od: (g, 0, 0)))
        in_specs.append(pl.BlockSpec((1, 1, b.shape[2]),
                                     lambda g, i, od: (g, 0, 0)))
        args += [w, b]
    in_specs.append(pl.BlockSpec((1, 1, out_pad), lambda g, i, od: (g, 0, 0)))
    in_specs.append(pl.BlockSpec((1, 1, out_pad), lambda g, i, od: (g, 0, 0)))
    args += [gamma, beta]

    out_spec = pl.BlockSpec((1, tile_m, out_pad), lambda g, i, od: (g, i, 0))

    # Advisory cost estimate for XLA's scheduler.
    flops = sum(2 * 2 * r_pad * w.shape[1] * w.shape[2] for w in w_stack)
    bytes_accessed = 4 * (xs.size
                          + sum(w.size for w in w_stack)
                          + sum(b.size for b in b_stack)
                          + gamma.size + beta.size
                          + 2 * r_pad * out_pad)
    cost = pl.CostEstimate(flops=flops, transcendentals=2 * r_pad,
                           bytes_accessed=bytes_accessed)

    return pl.pallas_call(
        kernel,
        out_shape=jax.ShapeDtypeStruct((2, r_pad, out_pad), jnp.float32),
        grid_spec=pltpu.PrefetchScalarGridSpec(
            num_scalar_prefetch=1,
            grid=grid,
            in_specs=in_specs,
            out_specs=out_spec,
        ),
        compiler_params=pltpu.CompilerParams(
            dimension_semantics=("parallel", "parallel"),
            # footprint here is ~1-2 MiB; 32 MiB is within every generation's
            # budget (v7x: 64 MiB physical / 32 MiB default scoped limit).
            vmem_limit_bytes=32 * 1024 * 1024,
        ),
        cost_estimate=cost,
    )(out_dims, *args)


def init_mlp_params(key, in_dim, hidden_dim, out_dim, num_layers):
    """Deterministic init for an MLP with sizes [in] + [hidden]*L + [out]."""
    sizes = [in_dim] + [hidden_dim] * num_layers + [out_dim]
    weights, biases = [], []
    for i in range(len(sizes) - 1):
        key, kw, kb = jax.random.split(key, 3)
        bound = 1.0 / math.sqrt(sizes[i])
        w = jax.random.uniform(kw, (sizes[i], sizes[i + 1]),
                               jnp.float32, -bound, bound)
        b = jax.random.uniform(kb, (sizes[i + 1],),
                               jnp.float32, -bound, bound)
        weights.append(w)
        biases.append(b)
    return weights, biases, key


class EncoderPallas:
    """JAX/Pallas equivalent of the PyTorch Encoder module (fused node+edge)."""

    def __init__(self, node_in, node_out, edge_in, edge_out,
                 mlp_num_layers, mlp_hidden_dim, key):
        self.node_in, self.node_out = node_in, node_out
        self.edge_in, self.edge_out = edge_in, edge_out
        self.num_linear = mlp_num_layers + 1

        # Unpadded parameters (kept for the pure-JAX reference check).
        self.node_w, self.node_b, key = init_mlp_params(
            key, node_in, mlp_hidden_dim, node_out, mlp_num_layers)
        self.edge_w, self.edge_b, key = init_mlp_params(
            key, edge_in, mlp_hidden_dim, edge_out, mlp_num_layers)
        self.node_gamma = jnp.ones((node_out,), jnp.float32)
        self.node_beta = jnp.zeros((node_out,), jnp.float32)
        self.edge_gamma = jnp.ones((edge_out,), jnp.float32)
        self.edge_beta = jnp.zeros((edge_out,), jnp.float32)

        # Lane-dense (128-padded), stacked parameters for the fused kernel.
        self.in_pad = _round_up(max(node_in, edge_in), _LANE)
        self.hid_pad = _round_up(mlp_hidden_dim, _LANE)
        self.out_pad = _round_up(max(node_out, edge_out), _LANE)
        pad_dims = ([self.in_pad] + [self.hid_pad] * mlp_num_layers
                    + [self.out_pad])

        self.w_stack, self.b_stack = [], []
        for i in range(self.num_linear):
            wn = _pad2(self.node_w[i], pad_dims[i], pad_dims[i + 1])
            we = _pad2(self.edge_w[i], pad_dims[i], pad_dims[i + 1])
            self.w_stack.append(jnp.stack([wn, we], axis=0))
            bn = _pad2(self.node_b[i].reshape(1, -1), 1, pad_dims[i + 1])
            be = _pad2(self.edge_b[i].reshape(1, -1), 1, pad_dims[i + 1])
            self.b_stack.append(jnp.stack([bn, be], axis=0))
        self.gamma_stack = jnp.stack(
            [_pad2(self.node_gamma.reshape(1, -1), 1, self.out_pad),
             _pad2(self.edge_gamma.reshape(1, -1), 1, self.out_pad)], axis=0)
        self.beta_stack = jnp.stack(
            [_pad2(self.node_beta.reshape(1, -1), 1, self.out_pad),
             _pad2(self.edge_beta.reshape(1, -1), 1, self.out_pad)], axis=0)
        self.out_dims = jnp.array([node_out, edge_out], jnp.int32)

    def __call__(self, x, edge_index, e_features):
        del edge_index  # unused in the reference forward pass (kept for parity)
        n_nodes = x.shape[0]
        n_edges = e_features.shape[0]
        rows_max = max(n_nodes, n_edges)

        # One block per network when small; otherwise 512-row tiles.  Rows are
        # zero-padded wrapper-side so tile_m never has to divide N or E.
        tile_m = min(512, _round_up(rows_max, _SUBLANE))
        r_pad = _round_up(rows_max, tile_m)

        xs = jnp.zeros((2, r_pad, self.in_pad), jnp.float32)
        xs = xs.at[0, :n_nodes, :self.node_in].set(x.astype(jnp.float32))
        xs = xs.at[1, :n_edges, :self.edge_in].set(
            e_features.astype(jnp.float32))

        out = _fused_encoder_call(xs, self.w_stack, self.b_stack,
                                  self.gamma_stack, self.beta_stack,
                                  self.out_dims, self.num_linear,
                                  tile_m, self.out_pad)
        node_y = out[0, :n_nodes, :self.node_out]
        edge_y = out[1, :n_edges, :self.edge_out]
        return node_y, edge_y


def _reference(x, e_features, enc):
    """Pure-JAX reference for a sanity check."""
    def run(h, ws, bs, g, b):
        for i, (w, bb) in enumerate(zip(ws, bs)):
            h = h @ w + bb
            if i < len(ws) - 1:
                h = jnp.maximum(h, 0.0)
        m = jnp.mean(h, axis=-1, keepdims=True)
        v = jnp.mean((h - m) ** 2, axis=-1, keepdims=True)
        return (h - m) / jnp.sqrt(v + 1e-5) * g + b
    return (run(x, enc.node_w, enc.node_b, enc.node_gamma, enc.node_beta),
            run(e_features, enc.edge_w, enc.edge_b, enc.edge_gamma,
                enc.edge_beta))


if __name__ == "__main__":
    key = jax.random.PRNGKey(0)

    # Small shapes consistent with the module's forward:
    node_in, node_out = 16, 32
    edge_in, edge_out = 8, 32
    mlp_num_layers, mlp_hidden_dim = 2, 32
    N, E = 128, 256

    key, k_x, k_e, k_idx, k_params = jax.random.split(key, 5)
    x = jax.random.normal(k_x, (N, node_in), jnp.float32)
    e_features = jax.random.normal(k_e, (E, edge_in), jnp.float32)
    edge_index = jax.random.randint(k_idx, (2, E), 0, N, jnp.int32)

    enc = EncoderPallas(node_in, node_out, edge_in, edge_out,
                        mlp_num_layers, mlp_hidden_dim, k_params)

    node_y, edge_y = enc(x, edge_index, e_features)
    node_y = jax.block_until_ready(node_y)
    edge_y = jax.block_until_ready(edge_y)

    # correctness check against pure-JAX reference
    ref_node, ref_edge = _reference(x, e_features, enc)
    assert node_y.shape == (N, node_out) and edge_y.shape == (E, edge_out)
    assert jnp.max(jnp.abs(node_y - ref_node)) < 1e-4
    assert jnp.max(jnp.abs(edge_y - ref_edge)) < 1e-4

    print("KERNEL_OK")
</pallas_src>

<mosaic_0001>
module attributes {stable_mosaic.version = 11 : i64} {
  func.func @kernel(%arg0: i32, %arg1: i32, %arg2: memref<2xi32, #tpu.memory_space<smem>>, %arg3: memref<1x256x128xf32, #tpu.memory_space<vmem>>, %arg4: memref<1x128x128xf32, #tpu.memory_space<vmem>>, %arg5: memref<1x1x128xf32, #tpu.memory_space<vmem>>, %arg6: memref<1x128x128xf32, #tpu.memory_space<vmem>>, %arg7: memref<1x1x128xf32, #tpu.memory_space<vmem>>, %arg8: memref<1x128x128xf32, #tpu.memory_space<vmem>>, %arg9: memref<1x1x128xf32, #tpu.memory_space<vmem>>, %arg10: memref<1x1x128xf32, #tpu.memory_space<vmem>>, %arg11: memref<1x1x128xf32, #tpu.memory_space<vmem>>, %arg12: memref<1x256x128xf32, #tpu.memory_space<vmem>>) attributes {dimension_semantics = [#tpu.dimension_semantics<parallel>, #tpu.dimension_semantics<parallel>], iteration_bounds = array<i64: 2, 1>, scalar_prefetch = 1 : i64, scratch_operands = 0 : i64, tpu.core_type = #tpu.core_type<tc>, window_params = [{transform_indices = @transform_0, window_bounds = array<i64: 1, 256, 128>}, {transform_indices = @transform_1, window_bounds = array<i64: 1, 128, 128>}, {transform_indices = @transform_2, window_bounds = array<i64: 1, 1, 128>}, {transform_indices = @transform_3, window_bounds = array<i64: 1, 128, 128>}, {transform_indices = @transform_4, window_bounds = array<i64: 1, 1, 128>}, {transform_indices = @transform_5, window_bounds = array<i64: 1, 128, 128>}, {transform_indices = @transform_6, window_bounds = array<i64: 1, 1, 128>}, {transform_indices = @transform_7, window_bounds = array<i64: 1, 1, 128>}, {transform_indices = @transform_8, window_bounds = array<i64: 1, 1, 128>}, {transform_indices = @transform_9, window_bounds = array<i64: 1, 256, 128>}]} {
    %c0 = arith.constant 0 : index
    %c0_0 = arith.constant 0 : index
    %c0_1 = arith.constant 0 : index
    %0 = vector.load %arg10[%c0, %c0_0, %c0_1] : memref<1x1x128xf32, #tpu.memory_space<vmem>>, vector<1x1x128xf32>
    %1 = vector.shape_cast %0 : vector<1x1x128xf32> to vector<1x128xf32>
    %c0_2 = arith.constant 0 : index
    %c0_3 = arith.constant 0 : index
    %c0_4 = arith.constant 0 : index
    %2 = vector.load %arg11[%c0_2, %c0_3, %c0_4] : memref<1x1x128xf32, #tpu.memory_space<vmem>>, vector<1x1x128xf32>
    %3 = vector.shape_cast %2 : vector<1x1x128xf32> to vector<1x128xf32>
    %4 = arith.index_cast %arg0 : i32 to index
    %5 = memref.load %arg2[%4] : memref<2xi32, #tpu.memory_space<smem>>
    %c0_5 = arith.constant 0 : index
    %c0_6 = arith.constant 0 : index
    %c0_7 = arith.constant 0 : index
    %6 = vector.load %arg3[%c0_5, %c0_6, %c0_7] : memref<1x256x128xf32, #tpu.memory_space<vmem>>, vector<1x256x128xf32>
    %7 = vector.shape_cast %6 : vector<1x256x128xf32> to vector<256x128xf32>
    %c0_8 = arith.constant 0 : index
    %c0_9 = arith.constant 0 : index
    %c0_10 = arith.constant 0 : index
    %8 = vector.load %arg4[%c0_8, %c0_9, %c0_10] : memref<1x128x128xf32, #tpu.memory_space<vmem>>, vector<1x128x128xf32>
    %9 = vector.shape_cast %8 : vector<1x128x128xf32> to vector<128x128xf32>
    %c0_11 = arith.constant 0 : index
    %c0_12 = arith.constant 0 : index
    %c0_13 = arith.constant 0 : index
    %10 = vector.load %arg5[%c0_11, %c0_12, %c0_13] : memref<1x1x128xf32, #tpu.memory_space<vmem>>, vector<1x1x128xf32>
    %11 = vector.shape_cast %10 : vector<1x1x128xf32> to vector<1x128xf32>
    %cst = arith.constant dense<0.000000e+00> : vector<256x128xf32>
    %12 = tpu.matmul %7, %9, %cst {dimension_numbers = #tpu.dot_dimension_numbers<[1], [0], [0], [1], [0, 0, 1, 1], [], []>} : vector<256x128xf32>, vector<128x128xf32>, vector<256x128xf32> -> vector<256x128xf32>
    %13 = vector.broadcast %11 : vector<1x128xf32> to vector<256x128xf32>
    %14 = arith.addf %12, %13 : vector<256x128xf32>
    %cst_14 = arith.constant 0.000000e+00 : f32
    %15 = vector.broadcast %cst_14 : f32 to vector<256x128xf32>
    %16 = arith.maximumf %14, %15 : vector<256x128xf32>
    %c0_15 = arith.constant 0 : index
    %c0_16 = arith.constant 0 : index
    %c0_17 = arith.constant 0 : index
    %17 = vector.load %arg6[%c0_15, %c0_16, %c0_17] : memref<1x128x128xf32, #tpu.memory_space<vmem>>, vector<1x128x128xf32>
    %18 = vector.shape_cast %17 : vector<1x128x128xf32> to vector<128x128xf32>
    %c0_18 = arith.constant 0 : index
    %c0_19 = arith.constant 0 : index
    %c0_20 = arith.constant 0 : index
    %19 = vector.load %arg7[%c0_18, %c0_19, %c0_20] : memref<1x1x128xf32, #tpu.memory_space<vmem>>, vector<1x1x128xf32>
    %20 = vector.shape_cast %19 : vector<1x1x128xf32> to vector<1x128xf32>
    %cst_21 = arith.constant dense<0.000000e+00> : vector<256x128xf32>
    %21 = tpu.matmul %16, %18, %cst_21 {dimension_numbers = #tpu.dot_dimension_numbers<[1], [0], [0], [1], [0, 0, 1, 1], [], []>} : vector<256x128xf32>, vector<128x128xf32>, vector<256x128xf32> -> vector<256x128xf32>
    %22 = vector.broadcast %20 : vector<1x128xf32> to vector<256x128xf32>
    %23 = arith.addf %21, %22 : vector<256x128xf32>
    %cst_22 = arith.constant 0.000000e+00 : f32
    %24 = vector.broadcast %cst_22 : f32 to vector<256x128xf32>
    %25 = arith.maximumf %23, %24 : vector<256x128xf32>
    %c0_23 = arith.constant 0 : index
    %c0_24 = arith.constant 0 : index
    %c0_25 = arith.constant 0 : index
    %26 = vector.load %arg8[%c0_23, %c0_24, %c0_25] : memref<1x128x128xf32, #tpu.memory_space<vmem>>, vector<1x128x128xf32>
    %27 = vector.shape_cast %26 : vector<1x128x128xf32> to vector<128x128xf32>
    %c0_26 = arith.constant 0 : index
    %c0_27 = arith.constant 0 : index
    %c0_28 = arith.constant 0 : index
    %28 = vector.load %arg9[%c0_26, %c0_27, %c0_28] : memref<1x1x128xf32, #tpu.memory_space<vmem>>, vector<1x1x128xf32>
    %29 = vector.shape_cast %28 : vector<1x1x128xf32> to vector<1x128xf32>
    %cst_29 = arith.constant dense<0.000000e+00> : vector<256x128xf32>
    %30 = tpu.matmul %25, %27, %cst_29 {dimension_numbers = #tpu.dot_dimension_numbers<[1], [0], [0], [1], [0, 0, 1, 1], [], []>} : vector<256x128xf32>, vector<128x128xf32>, vector<256x128xf32> -> vector<256x128xf32>
    %31 = vector.broadcast %29 : vector<1x128xf32> to vector<256x128xf32>
    %32 = arith.addf %30, %31 : vector<256x128xf32>
    %33 = tpu.iota {dimensions = array<i32: 1>} : vector<256x128xi32>
    %34 = vector.broadcast %5 : i32 to vector<256x128xi32>
    %35 = arith.cmpi slt, %33, %34 : vector<256x128xi32>
    %36 = arith.extui %35 : vector<256x128xi1> to vector<256x128xi32>
    %37 = arith.sitofp %36 : vector<256x128xi32> to vector<256x128xf32>
    %38 = arith.sitofp %5 : i32 to f32
    %cst_30 = arith.constant 1.000000e+00 : f32
    %39 = arith.divf %cst_30, %38 : f32
    %40 = arith.mulf %32, %37 : vector<256x128xf32>
    %cst_31 = arith.constant dense<0.000000e+00> : vector<256xf32>
    %41 = vector.multi_reduction <add>, %40, %cst_31 [1] : vector<256x128xf32> to vector<256xf32>
    %42 = vector.shape_cast %41 : vector<256xf32> to vector<256x1xf32>
    %43 = vector.broadcast %39 : f32 to vector<256x1xf32>
    %44 = arith.mulf %42, %43 : vector<256x1xf32>
    %45 = vector.broadcast %44 : vector<256x1xf32> to vector<256x128xf32>
    %46 = arith.subf %32, %45 : vector<256x128xf32>
    %47 = arith.mulf %46, %37 : vector<256x128xf32>
    %48 = arith.mulf %47, %47 : vector<256x128xf32>
    %cst_32 = arith.constant dense<0.000000e+00> : vector<256xf32>
    %49 = vector.multi_reduction <add>, %48, %cst_32 [1] : vector<256x128xf32> to vector<256xf32>
    %50 = vector.shape_cast %49 : vector<256xf32> to vector<256x1xf32>
    %51 = vector.broadcast %39 : f32 to vector<256x1xf32>
    %52 = arith.mulf %50, %51 : vector<256x1xf32>
    %cst_33 = arith.constant 9.99999974E-6 : f32
    %53 = vector.broadcast %cst_33 : f32 to vector<256x1xf32>
    %54 = arith.addf %52, %53 : vector<256x1xf32>
    %55 = math.rsqrt %54 : vector<256x1xf32>
    %56 = vector.broadcast %55 : vector<256x1xf32> to vector<256x128xf32>
    %57 = arith.mulf %47, %56 : vector<256x128xf32>
    %58 = vector.broadcast %1 : vector<1x128xf32> to vector<256x128xf32>
    %59 = arith.mulf %57, %58 : vector<256x128xf32>
    %60 = vector.broadcast %3 : vector<1x128xf32> to vector<256x128xf32>
    %61 = arith.addf %59, %60 : vector<256x128xf32>
    %c0_34 = arith.constant 0 : index
    %c0_35 = arith.constant 0 : index
    %c0_36 = arith.constant 0 : index
    %62 = vector.load %arg12[%c0_34, %c0_35, %c0_36] : memref<1x256x128xf32, #tpu.memory_space<vmem>>, vector<1x256x128xf32>
    %63 = vector.shape_cast %62 : vector<1x256x128xf32> to vector<256x128xf32>
    %64 = vector.shape_cast %61 : vector<256x128xf32> to vector<1x256x128xf32>
    tpu.vector_store %arg12[%c0_34, %c0_35, %c0_36], %64 {strides = array<i32>} : memref<1x256x128xf32, #tpu.memory_space<vmem>>, vector<1x256x128xf32>,
    return
  }
  func.func @transform_0(%arg0: i32, %arg1: i32, %arg2: memref<2xi32, #tpu.memory_space<smem>>) -> (i32, i32, i32) {
    %c0_i32 = arith.constant 0 : i32
    %c0_i32_0 = arith.constant 0 : i32
    return %arg0, %arg1, %c0_i32 : i32, i32, i32
  }
  func.func @transform_1(%arg0: i32, %arg1: i32, %arg2: memref<2xi32, #tpu.memory_space<smem>>) -> (i32, i32, i32) {
    %c0_i32 = arith.constant 0 : i32
    %c0_i32_0 = arith.constant 0 : i32
    %c0_i32_1 = arith.constant 0 : i32
    return %arg0, %c0_i32, %c0_i32_0 : i32, i32, i32
  }
  func.func @transform_2(%arg0: i32, %arg1: i32, %arg2: memref<2xi32, #tpu.memory_space<smem>>) -> (i32, i32, i32) {
    %c0_i32 = arith.constant 0 : i32
    %c0_i32_0 = arith.constant 0 : i32
    %c0_i32_1 = arith.constant 0 : i32
    return %arg0, %c0_i32, %c0_i32_0 : i32, i32, i32
  }
  func.func @transform_3(%arg0: i32, %arg1: i32, %arg2: memref<2xi32, #tpu.memory_space<smem>>) -> (i32, i32, i32) {
    %c0_i32 = arith.constant 0 : i32
    %c0_i32_0 = arith.constant 0 : i32
    %c0_i32_1 = arith.constant 0 : i32
    return %arg0, %c0_i32, %c0_i32_0 : i32, i32, i32
  }
  func.func @transform_4(%arg0: i32, %arg1: i32, %arg2: memref<2xi32, #tpu.memory_space<smem>>) -> (i32, i32, i32) {
    %c0_i32 = arith.constant 0 : i32
    %c0_i32_0 = arith.constant 0 : i32
    %c0_i32_1 = arith.constant 0 : i32
    return %arg0, %c0_i32, %c0_i32_0 : i32, i32, i32
  }
  func.func @transform_5(%arg0: i32, %arg1: i32, %arg2: memref<2xi32, #tpu.memory_space<smem>>) -> (i32, i32, i32) {
    %c0_i32 = arith.constant 0 : i32
    %c0_i32_0 = arith.constant 0 : i32
    %c0_i32_1 = arith.constant 0 : i32
    return %arg0, %c0_i32, %c0_i32_0 : i32, i32, i32
  }
  func.func @transform_6(%arg0: i32, %arg1: i32, %arg2: memref<2xi32, #tpu.memory_space<smem>>) -> (i32, i32, i32) {
    %c0_i32 = arith.constant 0 : i32
    %c0_i32_0 = arith.constant 0 : i32
    %c0_i32_1 = arith.constant 0 : i32
    return %arg0, %c0_i32, %c0_i32_0 : i32, i32, i32
  }
  func.func @transform_7(%arg0: i32, %arg1: i32, %arg2: memref<2xi32, #tpu.memory_space<smem>>) -> (i32, i32, i32) {
    %c0_i32 = arith.constant 0 : i32
    %c0_i32_0 = arith.constant 0 : i32
    %c0_i32_1 = arith.constant 0 : i32
    return %arg0, %c0_i32, %c0_i32_0 : i32, i32, i32
  }
  func.func @transform_8(%arg0: i32, %arg1: i32, %arg2: memref<2xi32, #tpu.memory_space<smem>>) -> (i32, i32, i32) {
    %c0_i32 = arith.constant 0 : i32
    %c0_i32_0 = arith.constant 0 : i32
    %c0_i32_1 = arith.constant 0 : i32
    return %arg0, %c0_i32, %c0_i32_0 : i32, i32, i32
  }
  func.func @transform_9(%arg0: i32, %arg1: i32, %arg2: memref<2xi32, #tpu.memory_space<smem>>) -> (i32, i32, i32) {
    %c0_i32 = arith.constant 0 : i32
    %c0_i32_0 = arith.constant 0 : i32
    return %arg0, %arg1, %c0_i32 : i32, i32, i32
  }
}

</mosaic_0001>

<bundles_post_ra>
// kernel: tpu_custom_call.1
= control target key start
LH: loop header
LB: loop body
LE: loop exit
PB: predicated region body
PF: predicated region fallthrough
CT: control target
= control target key end

     0   :  { %s2972_s13 = smov [#allocation3]   ;;  %s4023_s0 = inlined_call_operand.hbm [shape: s32[2], index: 0, kind: input, shape index: {}]   ;;  %s4024_s1 = inlined_call_operand.hbm [shape: f32[2,256,128], index: 1, kind: input, shape index: {}]   ;;  %s4025_s2 = inlined_call_operand.hbm [shape: f32[2,128,128], index: 2, kind: input, shape index: {}]   ;;  %s4026_s3 = inlined_call_operand.vmem [shape: f32[2,1,128], index: 3, kind: input, shape index: {}]   ;;  %s4027_s4 = inlined_call_operand.hbm [shape: f32[2,128,128], index: 4, kind: input, shape index: {}]   ;;  %s4028_s5 = inlined_call_operand.vmem [shape: f32[2,1,128], index: 5, kind: input, shape index: {}]   ;;  %s4029_s6 = inlined_call_operand.hbm [shape: f32[2,128,128], index: 6, kind: input, shape index: {}]   ;;  %s4030_s7 = inlined_call_operand.vmem [shape: f32[2,1,128], index: 7, kind: input, shape index: {}]   ;;  %s4031_s8 = inlined_call_operand.vmem [shape: f32[2,1,128], index: 8, kind: input, shape index: {}]   ;;  %s4032_s9 = inlined_call_operand.vmem [shape: f32[2,1,128], index: 9, kind: input, shape index: {}]   ;;  %s4033_s10 = inlined_call_operand.hbm [shape: f32[2,256,128], index: 10, kind: output, shape index: {}]  }
   0x1   :  { %4046 = sst [smem:[#allocation25_spill]] %s4025_s2 }
   0x2   :  { %4047 = sst [smem:[#allocation26_spill]] %s4030_s7 }
   0x3   :  { %4048 = sst [smem:[#allocation27_spill]] %s4031_s8 }
   0x4   :  { %4049 = sst [smem:[#allocation28_spill]] %s4032_s9 }
   0x5   :  { %4050 = sst [smem:[#allocation29_spill]] %s4033_s10 }
   0x6   :  { %16 = dma.hbm_to_smem %s4023_s0, 16, %s2972_s13, [#allocation2] }
   0x7   :  { %2930 = dma.done.wait [#allocation2], 16 }
   0x8   :  { %2931 = vsyncadd [#allocation2], 4294967280 }
   0x9   :  { %18 = sfence }
   0xa   :  { %19 = vsyncpa [#allocation5], 0 }
   0xb   :  { %21 = vsyncpa [#allocation5 + $0x1], 0 }
   0xc   :  { %22 = vsyncpa [#allocation8], 0 }
   0xd   :  { %24 = vsyncpa [#allocation8 + $0x1], 0 }
   0xe   :  { %25 = vsyncpa [#allocation11], 0 }
   0xf   :  { %27 = vsyncpa [#allocation11 + $0x1], 0 }
  0x10   :  { %28 = vsyncpa [#allocation6], 0 }
  0x11   :  { %30 = vsyncpa [#allocation6 + $0x1], 0  ;;  %s3041_s16 = smov 0   ;;  %s3043_s17 = smov 0  }
  0x12   :  { %s3045_s18 = smov 0   ;;  %s3047_s19 = smov 0  }
  0x13   :  { %s3049_s0 = smov 0   ;;  %s3051_s20 = smov 0  }
  0x14 LB: > { %4051 = sst [smem:[#allocation18_spill]] %s2950_s16  ;;  %s3072_s21 = sadd.s32 4294967295, %s2970_s20   ;;  %s2970_s20 = sphi %s3051_s20, %s36_s20   ;;  %s2966_s0 = sphi %s3049_s0, %s4078_s0   ;;  %s2962_s19 = sphi %s3047_s19, %s4077_s19   ;;  %s2958_s18 = sphi %s3045_s18, %s4076_s18   ;;  %s2954_s17 = sphi %s3043_s17, %s4080_s17   ;;  %s2950_s16 = sphi %s3041_s16, %s4079_s16  }
  0x15   : > { %4052 = sst [smem:[#allocation19_spill]] %s2958_s18  ;;  %s2156_s22 = sadd.s32 4294967294, %s2970_s20  }
  0x16   : > { %4053 = sst [smem:[#allocation20_spill]] %s2966_s0  ;;  %s48_s23 = sadd.s32 1, %s2966_s0 }
  0x17   : > { %s57_s24 = sadd.s32 1, %s2958_s18  ;;  %p50_p0 = scmp.ge.s32.totalorder %s48_s23, 2 }
  0x18   : > { %p64_p1 = scmp.ne.s32.totalorder %s2958_s18, %s2954_s17  ;;  %p65_p2 = scmp.eq.s32.totalorder %s2970_s20, 0 }
  0x19   : > { %p70_p3 = scmp.ne.s32.totalorder %s2954_s17, %s2950_s16  ;;  %s4082_s23 = smov (%p50_p0, %s48_s23), 0 }
  0x1a   : > { %4054 = sst [smem:[#allocation21_spill]] %s4082_s23  ;;  %p3084_p4 = por %p65_p2, %p64_p1 }
  0x1b   : > { %p71_p5 = scmp.eq.s32.totalorder %s3072_s21, 0  ;;  %s52_s26 = ssub.s32 %s2966_s0, %s4082_s23 }
  0x1c   : > { %p304_p6 = scmp.eq.s32.totalorder %s3072_s21, 1  ;;  %p55_p7 = scmp.eq.s32.totalorder %s52_s26, 0 }
  0x1d   : > { %p3092_p8 = por %p71_p5, %p70_p3  ;;  %p310_p10 = scmp.eq.s32.totalorder %s2156_s22, 1 }
  0x1e   : > { %p3096_p9 = por %p304_p6, %p64_p1  ;;  %p2638_p13 = scmp.lt.s32.totalorder %s2970_s20, 2 }
  0x1f   : > { %s3101_s29 = scalar_select %p55_p7, %s2958_s18, %s57_s24  }
  0x20   : > { %s4057_s28 = scalar_select %p3096_p9, 1, 0 }
  0x21   : > { %4059 = sst [smem:[#allocation23_spill]] %s3101_s29  ;;  %p3103_p11 = por %p310_p10, %p70_p3 }
  0x22   : > { %4058 = sst [smem:[#allocation22_spill]] %s4057_s28  ;;  %s3110_s11 = sand.u32 1, %s2958_s18  }
  0x23   : > { %s4060_s30 = scalar_select %p3103_p11, 1, 0 }
  0x24   : > { %p3114_p0 = pnand %p2638_p13, %p3084_p4  ;;  %s353_s13 = sand.u32 1, %s2970_s20  }
  0x25   : > { %4061 = sst [smem:[#allocation24_spill]] %s4060_s30  ;;  %s3120_s14 = sshll.u32 %s3110_s11, 7 }
  0x26   : > { %s3123_s15 = sshll.u32 %s2966_s0, 11  ;;  %s357_s22 = scalar_lea.vmem [#allocation7], %s3120_s14 }
  0x27   : > { %s364_s24 = sshll.u32 %s357_s22, 4  ;;  %s4063_s2 = sld [smem:[#allocation25_spill]]  ;;  %s365_s24 = int_to_ptr.vmem [resolvable:$true] %s364_s24 }
  0x28   : > { %s3130_s29 = scalar_lea.sflag [#allocation8], %s353_s13  ;;  %p2770_p1 = pneg %p3114_p0 }
  0x29   : > { %s2781_s18 = scalar_lea.vmem %s365_s24, 2048  ;;  %s2973_s30 = smov [#allocation7]  }
  0x2a   : > { %p2782_p2 = scmp.ne.s32.totalorder %s365_s24, %s2781_s18  ;;  %s2786_s16 = sshll.u32 %s2973_s30, 4  ;;  %s2787_s16 = int_to_ptr.vmem [resolvable:$false] %s2786_s16 }
  0x2b   : > { %s2788_s10 = scalar_lea.vmem %s2787_s16, 4096  ;;  %p2789_p5 = scmp.lt.s32.totalorder %s365_s24, %s2787_s16 }
  0x2c   : > { %p2784_p3 = pnand %p2782_p2, %p2770_p1  ;;  %p2790_p6 = scmp.lt.s32.totalorder %s2788_s10, %s2781_s18 }
  0x2d   : > { %s363_s25 = scalar_lea.hbm %s4063_s2, %s3123_s15 }
  0x2e   : > { %p2785_p4 = pneg %p2784_p3  ;;  %p2791_p7 = por %p2790_p6, %p2789_p5 }
  0x30   : > { %p2792_p10 = pnand %p2791_p7, %p2785_p4 }
  0x32   : > { %2795 = shalt.err (!%p2792_p10)
}
  0x33   : > { %s4041_s23 = smov 128   ;;  %s4043_s13 = smov 8  }
  0x34   : > { %2627 = dma.hbm_to_vmem [thread:$0]  (!%p3114_p0), %s363_s25, 2048, %s365_s24, %s3130_s29, %s4041_s23, %s4041_s23, %s4043_s13  }
  0x35   : > { %p2171_p13 = scmp.ge.s32.totalorder %s2970_s20, 1  ;;  %p444_p2 = scmp.lt.s32.totalorder %s2970_s20, 3 }
  0x36   : > { %s2159_s16 = sshll.u32 %s3110_s11, 8  ;;  %s2188_s18 = sshll.u32 %s2966_s0, 12 }
  0x37   : > { %p3145_p3 = pnand %p2171_p13, %p444_p2  ;;  %s342_s26 = scalar_lea.hbm %s4024_s1, %s2188_s18 }
  0x38   : > { %s334_s2 = scalar_lea.vmem [#allocation4], %s2159_s16  ;;  %s390_s7 = scalar_lea.hbm %s4027_s4, %s3123_s15 }
  0x39   : > { %s343_s28 = sshll.u32 %s334_s2, 4  ;;  %s331_s24 = scalar_lea.sflag [#allocation5], %s3110_s11  ;;  %s344_s28 = int_to_ptr.vmem [resolvable:$true] %s343_s28 }
  0x3a   : > { %s2809_s25 = scalar_lea.vmem %s344_s28, 4096  ;;  %s2976_s23 = smov [#allocation4]  }
  0x3b   : > { %p2810_p4 = scmp.ne.s32.totalorder %s344_s28, %s2809_s25  ;;  %s2814_s13 = sshll.u32 %s2976_s23, 4  ;;  %s2815_s13 = int_to_ptr.vmem [resolvable:$false] %s2814_s13 }
  0x3c   : > { %s2816_s0 = scalar_lea.vmem %s2815_s13, 8192  ;;  %p2817_p7 = scmp.lt.s32.totalorder %s344_s28, %s2815_s13 }
  0x3d   : > { %p2812_p5 = pnand %p2810_p4, %p2770_p1  ;;  %p2818_p10 = scmp.lt.s32.totalorder %s2816_s0, %s2809_s25 }
  0x3f   : > { %p2813_p6 = pneg %p2812_p5  ;;  %p2819_p13 = por %p2818_p10, %p2817_p7 }
  0x41   : > { %p2820_p2 = pnand %p2819_p13, %p2813_p6 }
  0x43   : > { %2823 = shalt.err (!%p2820_p2)
}
  0x44   : > { %s4065_s2 = smov 8   ;;  %s4066_s8 = smov 128  }
  0x45   : > { %2624 = dma.hbm_to_vmem [thread:$0]  (!%p3114_p0), %s342_s26, 4096, %s344_s28, %s331_s24, %s4066_s8, %s4066_s8, %s4065_s2  }
  0x46   : > { %s384_s9 = scalar_lea.vmem [#allocation9], %s3120_s14  ;;  %s2977_s0 = smov [#allocation9]  }
  0x47   : > { %s391_s16 = sshll.u32 %s384_s9, 4  ;;  %s2842_s23 = sshll.u32 %s2977_s0, 4  ;;  %s392_s16 = int_to_ptr.vmem [resolvable:$true] %s391_s16  ;;  %s2843_s23 = int_to_ptr.vmem [resolvable:$false] %s2842_s23 }
  0x48   : > { %s2837_s18 = scalar_lea.vmem %s392_s16, 2048  ;;  %s2844_s13 = scalar_lea.vmem %s2843_s23, 4096 }
  0x49   : > { %p2838_p4 = scmp.ne.s32.totalorder %s392_s16, %s2837_s18  ;;  %p2845_p6 = scmp.lt.s32.totalorder %s392_s16, %s2843_s23 }
  0x4a   : > { %p2846_p7 = scmp.lt.s32.totalorder %s2844_s13, %s2837_s18 }
  0x4b   : > { %p2840_p5 = pnand %p2838_p4, %p2770_p1 }
  0x4c   : > { %p2847_p10 = por %p2846_p7, %p2845_p6 }
  0x4d   : > { %p2841_p12 = pneg %p2840_p5 }
  0x4f   : > { %p2848_p13 = pnand %p2847_p10, %p2841_p12 }
  0x51   : > { %2851 = shalt.err (!%p2848_p13)
}
  0x52   : > { %2630 = dma.hbm_to_vmem [thread:$0]  (!%p3114_p0), %s390_s7, 2048, %s392_s16, %s3130_s29, %s4066_s8, %s4066_s8, %s4065_s2  }
  0x53   : > { %s417_s24 = scalar_lea.hbm %s4029_s6, %s3123_s15  ;;  %s411_s25 = scalar_lea.vmem [#allocation10], %s3120_s14 }
  0x54   : > { %s418_s9 = sshll.u32 %s411_s25, 4  ;;  %s408_s18 = scalar_lea.sflag [#allocation11], %s3110_s11  ;;  %s419_s9 = int_to_ptr.vmem [resolvable:$true] %s418_s9 }
  0x55   : > { %s2865_s0 = scalar_lea.vmem %s419_s9, 2048  ;;  %s2978_s23 = smov [#allocation10]  }
  0x56   : > { %p2866_p12 = scmp.ne.s32.totalorder %s419_s9, %s2865_s0  ;;  %s2870_s13 = sshll.u32 %s2978_s23, 4  ;;  %s2871_s13 = int_to_ptr.vmem [resolvable:$false] %s2870_s13 }
  0x57   : > { %s2872_s28 = scalar_lea.vmem %s2871_s13, 4096  ;;  %p2873_p5 = scmp.lt.s32.totalorder %s419_s9, %s2871_s13 }
  0x58   : > { %p2868_p2 = pnand %p2866_p12, %p2770_p1  ;;  %p2874_p6 = scmp.lt.s32.totalorder %s2872_s28, %s2865_s0 }
  0x5a   : > { %p2869_p4 = pneg %p2868_p2  ;;  %p2875_p7 = por %p2874_p6, %p2873_p5 }
  0x5c   : > { %p2876_p10 = pnand %p2875_p7, %p2869_p4 }
  0x5e   : > { %2879 = shalt.err (!%p2876_p10)
}
  0x5f   : > { %2633 = dma.hbm_to_vmem [thread:$0]  (!%p3114_p0), %s417_s24, 2048, %s419_s9, %s408_s18, %s4066_s8, %s4066_s8, %s4065_s2  }
  0x60   : > { %448 = sbr.rel (%p3145_p3) target bundleno = 1125 (0x465), region = 56  ;;  %s3199_s7 = sand.u32 (!%p3145_p3), 1, %s2954_s17  }
  0x61   : > { %s2172_s29 = sshll.u32 (!%p3145_p3), %s3199_s7, 8  ;;  %s451_s11 = scalar_lea.sflag (!%p3145_p3), [#allocation5], %s3199_s7 }
  0x62   : > { %s3205_s14 = scalar_lea.vmem (!%p3145_p3), [#allocation4], %s2172_s29 }
  0x65   : > { %2933 = dma.done.wait (%p3092_p8), %s451_s11, 4096  }
  0x66   : > { %2935 = vsyncadd (%p3092_p8), %s451_s11, 4294963200  ;;  %s459_s12 = sand.u32 1, %s3072_s21   ;;  %s2173_s15 = sshll.u32 %s3199_s7, 7 }
  0x67   : > { %s460_s10 = scalar_lea.sflag [#allocation8], %s459_s12  ;;  %s3213_s2 = scalar_lea.vmem [#allocation7], %s2173_s15 }
  0x68   : > { %2937 = dma.done.wait (%p3092_p8), %s460_s10, 4096  }
  0x69   : > { %2939 = vsyncadd (%p3092_p8), %s460_s10, 4294963200  ;;  %s3219_s8 = scalar_lea.vmem [#allocation9], %s2173_s15  ;;  %s478_s16 = scalar_lea.sflag [#allocation11], %s3199_s7 }
  0x6a   : > { %s3222_s30 = scalar_lea.vmem [#allocation10], %s2173_s15 }
  0x6b   : > { %2941 = dma.done.wait (%p3092_p8), %s478_s16, 2048  }
  0x6c   : > { %2943 = vsyncadd (%p3092_p8), %s478_s16, 4294965248  ;;  %v613_v0 = vld [vmem:[%s3213_s2 + $0x78] sm:$0xff]  ;;  %v612_v1 = vld [vmem:[%s3213_s2 + $0x70] sm:$0xff]  ;;  %p547_p8 = scmp.lt.s32.totalorder %s2962_s19, 1  ;;  %s565_s18 = sld [smem:[#allocation3 + %s2962_s19]] }
  0x6d   : > { %2337 = vmatprep.subr.mxu0 %v613_v0  ;;  %2577 = vmatprep.subr.mxu1 %v613_v0  ;;  %v611_v2 = vld [vmem:[%s3213_s2 + $0x68] sm:$0xff]  ;;  %v610_v3 = vld [vmem:[%s3213_s2 + $0x60] sm:$0xff]  ;;  %v609_v5 = vld [vmem:[%s3213_s2 + $0x58] sm:$0xff]  ;;  %s4067_s28 = sld [smem:[#allocation26_spill]]  ;;  %s2192_s22 = sshll.u32 %s2962_s19, 12 }
  0x6e   : > { %2338 = vmatpush3.msra.mxu0 %v613_v0  ;;  %2593 = vmatpush3.msra.mxu1 %v613_v0  ;;  %v566_v4 = vld [vmem:[%s3205_s14] sm:$0xff]  ;;  %v608_v6 = vld [vmem:[%s3213_s2 + $0x50] sm:$0xff]  ;;  %v607_v7 = vld [vmem:[%s3213_s2 + $0x48] sm:$0xff]  ;;  %s3307_s21 = scalar_select %p547_p8, %s2962_s19, 1 }
  0x6f   : > { %2339 = vmatprep.subr.mxu0 %v612_v1  ;;  %2578 = vmatprep.subr.mxu1 %v612_v1  ;;  %v606_v8 = vld [vmem:[%s3213_s2 + $0x40] sm:$0xff]  ;;  %v605_v9 = vld [vmem:[%s3213_s2 + $0x38] sm:$0xff]  ;;  %v604_v10 = vld [vmem:[%s3213_s2 + $0x30] sm:$0xff]  ;;  %s4068_s10 = sld [smem:[#allocation27_spill]]  ;;  %s1942_s19 = scalar_lea.sflag [#allocation6], %s3199_s7 }
  0x70   : > { %2340 = vmatpush3.msra.mxu0 %v612_v1  ;;  %2594 = vmatpush3.msra.mxu1 %v612_v1  ;;  %v603_v11 = vld [vmem:[%s3213_s2 + $0x28] sm:$0xff]  ;;  %v602_v12 = vld [vmem:[%s3213_s2 + $0x20] sm:$0xff]  ;;  %v601_v13 = vld [vmem:[%s3213_s2 + $0x18] sm:$0xff]  ;;  %s549_s26 = scalar_lea.vmem %s4026_s3, %s3307_s21  ;;  %s552_s9 = scalar_lea.vmem %s4028_s5, %s3307_s21 }
  0x71   : > { %2341 = vmatprep.subr.mxu0 %v611_v2  ;;  %2579 = vmatprep.subr.mxu1 %v611_v2  ;;  %v600_v14 = vld [vmem:[%s3213_s2 + $0x10] sm:$0xff]  ;;  %v599_v15 = vld [vmem:[%s3213_s2 + $0x8] sm:$0xff]  ;;  %v598_v16 = vld [vmem:[%s3213_s2] sm:$0xff]  ;;  %s2980_s23 = smov [#allocation12]  }
  0x72   : > { %2342 = vmatpush3.msra.mxu0 %v611_v2  ;;  %2369 = vmatprep.mubr.f32.mxu0 %v566_v4  ;;  %v567_v17 = vld [vmem:[%s3205_s14 + $0x8] sm:$0xff]  ;;  %v568_v18 = vld [vmem:[%s3205_s14 + $0x10] sm:$0xff]  ;;  %v582_v19 = vld [vmem:[%s3205_s14 + $0x80] sm:$0xff]  ;;  %s1412_s0 = scvt.s32.f32 %s565_s18  ;;  %s2884_s13 = sshll.u32 %s2980_s23, 4  ;;  %s2885_s13 = int_to_ptr.vmem [resolvable:$false] %s2884_s13 }
  0x73   : > { %2343 = vmatprep.subr.mxu0 %v610_v3  ;;  %2595 = vmatpush3.msra.mxu1 %v611_v2  ;;  %v583_v20 = vld [vmem:[%s3205_s14 + $0x88] sm:$0xff]  ;;  %v893_v21 = vld [vmem:[%s3219_s8 + $0x78] sm:$0xff]  ;;  %v584_v22 = vld [vmem:[%s3205_s14 + $0x90] sm:$0xff]  ;;  %s555_s11 = scalar_lea.vmem %s4067_s28, %s3307_s21  ;;  %s2886_s28 = scalar_lea.vmem %s2885_s13, 8192 }
  0x74   : > { %2344 = vmatpush3.msra.mxu0 %v610_v3  ;;  %2580 = vmatprep.subr.mxu1 %v610_v3  ;;  %v569_v23 = vld [vmem:[%s3205_s14 + $0x18] sm:$0xff]  ;;  %v892_v24 = vld [vmem:[%s3219_s8 + $0x70] sm:$0xff]  ;;  %v570_v25 = vld [vmem:[%s3205_s14 + $0x20] sm:$0xff] }
  0x75   : > { %2345 = vmatprep.subr.mxu0 %v609_v5  ;;  %2596 = vmatpush3.msra.mxu1 %v610_v3  ;;  %v585_v26 = vld [vmem:[%s3205_s14 + $0x98] sm:$0xff]  ;;  %v891_v27 = vld [vmem:[%s3219_s8 + $0x68] sm:$0xff]  ;;  %v586_v28 = vld [vmem:[%s3205_s14 + $0xa0] sm:$0xff]  ;;  %s558_s2 = scalar_lea.vmem %s4068_s10, %s3307_s21 }
  0x76   : > { %2346 = vmatpush3.msra.mxu0 %v609_v5  ;;  %2581 = vmatprep.subr.mxu1 %v609_v5  ;;  %v571_v29 = vld [vmem:[%s3205_s14 + $0x28] sm:$0xff]  ;;  %v890_v30 = vld [vmem:[%s3219_s8 + $0x60] sm:$0xff]  ;;  %v572_v31 = vld [vmem:[%s3205_s14 + $0x30] sm:$0xff] }
  0x77   : > { %2347 = vmatprep.subr.mxu0 %v608_v6  ;;  %2597 = vmatpush3.msra.mxu1 %v609_v5  ;;  %v587_v32 = vld [vmem:[%s3205_s14 + $0xa8] sm:$0xff]  ;;  %v889_v33 = vld [vmem:[%s3219_s8 + $0x58] sm:$0xff]  ;;  %v588_v34 = vld [vmem:[%s3205_s14 + $0xb0] sm:$0xff] }
  0x78   : > { %2348 = vmatpush3.msra.mxu0 %v608_v6  ;;  %2582 = vmatprep.subr.mxu1 %v608_v6  ;;  %v573_v35 = vld [vmem:[%s3205_s14 + $0x38] sm:$0xff]  ;;  %v888_v36 = vld [vmem:[%s3219_s8 + $0x50] sm:$0xff]  ;;  %v574_v37 = vld [vmem:[%s3205_s14 + $0x40] sm:$0xff] }
  0x79   : > { %2349 = vmatprep.subr.mxu0 %v607_v7  ;;  %2598 = vmatpush3.msra.mxu1 %v608_v6  ;;  %v589_v38 = vld [vmem:[%s3205_s14 + $0xb8] sm:$0xff]  ;;  %v887_v39 = vld [vmem:[%s3219_s8 + $0x48] sm:$0xff]  ;;  %v590_v40 = vld [vmem:[%s3205_s14 + $0xc0] sm:$0xff] }
  0x7a   : > { %2350 = vmatpush3.msra.mxu0 %v607_v7  ;;  %2583 = vmatprep.subr.mxu1 %v607_v7  ;;  %v575_v41 = vld [vmem:[%s3205_s14 + $0x48] sm:$0xff]  ;;  %v886_v42 = vld [vmem:[%s3219_s8 + $0x40] sm:$0xff]  ;;  %v576_v43 = vld [vmem:[%s3205_s14 + $0x50] sm:$0xff] }
  0x7b   : > { %2351 = vmatprep.subr.mxu0 %v606_v8  ;;  %2599 = vmatpush3.msra.mxu1 %v607_v7  ;;  %v591_v44 = vld [vmem:[%s3205_s14 + $0xc8] sm:$0xff]  ;;  %v885_v45 = vld [vmem:[%s3219_s8 + $0x38] sm:$0xff]  ;;  %v592_v46 = vld [vmem:[%s3205_s14 + $0xd0] sm:$0xff] }
  0x7c   : > { %2352 = vmatpush3.msra.mxu0 %v606_v8  ;;  %2584 = vmatprep.subr.mxu1 %v606_v8  ;;  %v577_v47 = vld [vmem:[%s3205_s14 + $0x58] sm:$0xff]  ;;  %v884_v48 = vld [vmem:[%s3219_s8 + $0x30] sm:$0xff]  ;;  %v578_v49 = vld [vmem:[%s3205_s14 + $0x60] sm:$0xff] }
  0x7d   : > { %2353 = vmatprep.subr.mxu0 %v605_v9  ;;  %2600 = vmatpush3.msra.mxu1 %v606_v8  ;;  %v593_v50 = vld [vmem:[%s3205_s14 + $0xd8] sm:$0xff]  ;;  %v883_v51 = vld [vmem:[%s3219_s8 + $0x28] sm:$0xff]  ;;  %v594_v52 = vld [vmem:[%s3205_s14 + $0xe0] sm:$0xff] }
  0x7e   : > { %2354 = vmatpush3.msra.mxu0 %v605_v9  ;;  %2585 = vmatprep.subr.mxu1 %v605_v9  ;;  %v579_v53 = vld [vmem:[%s3205_s14 + $0x68] sm:$0xff]  ;;  %v882_v54 = vld [vmem:[%s3219_s8 + $0x20] sm:$0xff]  ;;  %v580_v55 = vld [vmem:[%s3205_s14 + $0x70] sm:$0xff] }
  0x7f   : > { %2355 = vmatprep.subr.mxu0 %v604_v10  ;;  %2601 = vmatpush3.msra.mxu1 %v605_v9  ;;  %v595_v56 = vld [vmem:[%s3205_s14 + $0xe8] sm:$0xff]  ;;  %v881_v57 = vld [vmem:[%s3219_s8 + $0x18] sm:$0xff]  ;;  %v596_v58 = vld [vmem:[%s3205_s14 + $0xf0] sm:$0xff] }
  0x80   : > { %2356 = vmatpush3.msra.mxu0 %v604_v10  ;;  %2586 = vmatprep.subr.mxu1 %v604_v10  ;;  %v581_v59 = vld [vmem:[%s3205_s14 + $0x78] sm:$0xff]  ;;  %v880_v61 = vld [vmem:[%s3219_s8 + $0x10] sm:$0xff]  ;;  %v879_v62 = vld [vmem:[%s3219_s8 + $0x8] sm:$0xff] }
  0x81   : > { %2357 = vmatprep.subr.mxu0 %v603_v11  ;;  %2602 = vmatpush3.msra.mxu1 %v604_v10  ;;  %v597_v60 = vld [vmem:[%s3205_s14 + $0xf8] sm:$0xff]  ;;  %v878_v63 = vld [vmem:[%s3219_s8] sm:$0xff]  ;;  %v1172_v1 = vld [vmem:[%s3222_s30 + $0x70] sm:$0xff] }
  0x82   : > { %2358 = vmatpush3.msra.mxu0 %v603_v11  ;;  %2587 = vmatprep.subr.mxu1 %v603_v11  ;;  %v1173_v0 = vld [vmem:[%s3222_s30 + $0x78] sm:$0xff]  ;;  %v1171_v2 = vld [vmem:[%s3222_s30 + $0x68] sm:$0xff]  ;;  %v1170_v3 = vld [vmem:[%s3222_s30 + $0x60] sm:$0xff] }
  0x83   : > { %2359 = vmatprep.subr.mxu0 %v602_v12  ;;  %2603 = vmatpush3.msra.mxu1 %v603_v11  ;;  %v1169_v4 = vld [vmem:[%s3222_s30 + $0x58] sm:$0xff]  ;;  %v1168_v5 = vld [vmem:[%s3222_s30 + $0x50] sm:$0xff]  ;;  %v1167_v6 = vld [vmem:[%s3222_s30 + $0x48] sm:$0xff] }
  0x84   : > { %2360 = vmatpush3.msra.mxu0 %v602_v12  ;;  %2588 = vmatprep.subr.mxu1 %v602_v12  ;;  %v1166_v7 = vld [vmem:[%s3222_s30 + $0x40] sm:$0xff]  ;;  %v1165_v8 = vld [vmem:[%s3222_s30 + $0x38] sm:$0xff]  ;;  %v1164_v9 = vld [vmem:[%s3222_s30 + $0x30] sm:$0xff] }
  0x85   : > { %2361 = vmatprep.subr.mxu0 %v601_v13  ;;  %2604 = vmatpush3.msra.mxu1 %v602_v12  ;;  %v1163_v10 = vld [vmem:[%s3222_s30 + $0x28] sm:$0xff]  ;;  %v1162_v11 = vld [vmem:[%s3222_s30 + $0x20] sm:$0xff]  ;;  %v1161_v12 = vld [vmem:[%s3222_s30 + $0x18] sm:$0xff] }
  0x86   : > { %2362 = vmatpush3.msra.mxu0 %v601_v13  ;;  %2589 = vmatprep.subr.mxu1 %v601_v13 }
  0x87   : > { %2363 = vmatprep.subr.mxu0 %v600_v14  ;;  %2605 = vmatpush3.msra.mxu1 %v601_v13  ;;  %v3313_v13 = vld [vmem:[%s549_s26] ss:$0 sm:$0xff] }
  0x88   : > { %2364 = vmatpush3.msra.mxu0 %v600_v14  ;;  %2590 = vmatprep.subr.mxu1 %v600_v14 }
  0x89   : > { %2365 = vmatprep.subr.mxu0 %v599_v15  ;;  %2606 = vmatpush3.msra.mxu1 %v600_v14 }
  0x8a   : > { %2366 = vmatpush3.msra.mxu0 %v599_v15  ;;  %2591 = vmatprep.subr.mxu1 %v599_v15 }
  0x8b   : > { %2367 = vmatprep.subr.mxu0 %v598_v16  ;;  %2607 = vmatpush3.msra.mxu1 %v599_v15 }
  0x8c   : > { %2368 = vmatpush3.msra.mxu0 %v598_v16  ;;  %2592 = vmatprep.subr.mxu1 %v598_v16 }
  0x8d   : > { %2370 = vmatmul.mubr.f32.vlgmr.msra.gmra.mxu0 %v567_v17  ;;  %2608 = vmatpush3.msra.mxu1 %v598_v16 }
  0x8e   : > { %2372 = vmatprep.mubr.f32.mxu0 %v568_v18  ;;  %2393 = vmatprep.mubr.f32.mxu1 %v582_v19 }
  0x8f   : > { %2394 = vmatmul.mubr.f32.vlgmr.msra.gmra.mxu1 %v583_v20  ;;  %2417 = vmatprep.subr.mxu1 %v893_v21 }
  0x90   : > { %2396 = vmatprep.mubr.f32.mxu1 %v584_v22  ;;  %2418 = vmatpush3.msra.mxu1 %v893_v21 }
  0x91   : > { %2373 = vmatmul.mubr.f32.gmra.mxu0 %v569_v23  ;;  %2419 = vmatprep.subr.mxu1 %v892_v24 }
  0x92   : > { %2375 = vmatprep.mubr.f32.mxu0 %v570_v25  ;;  %2420 = vmatpush3.msra.mxu1 %v892_v24 }
  0x93   : > { %2397 = vmatmul.mubr.f32.gmra.mxu1 %v585_v26  ;;  %2421 = vmatprep.subr.mxu1 %v891_v27 }
  0x94   : > { %2399 = vmatprep.mubr.f32.mxu1 %v586_v28  ;;  %2422 = vmatpush3.msra.mxu1 %v891_v27 }
  0x95   : > { %2376 = vmatmul.mubr.f32.gmra.mxu0 %v571_v29  ;;  %2423 = vmatprep.subr.mxu1 %v890_v30 }
  0x96   : > { %2378 = vmatprep.mubr.f32.mxu0 %v572_v31  ;;  %2424 = vmatpush3.msra.mxu1 %v890_v30 }
  0x97   : > { %2400 = vmatmul.mubr.f32.gmra.mxu1 %v587_v32  ;;  %2425 = vmatprep.subr.mxu1 %v889_v33 }
  0x98   : > { %2402 = vmatprep.mubr.f32.mxu1 %v588_v34  ;;  %2426 = vmatpush3.msra.mxu1 %v889_v33 }
  0x99   : > { %2379 = vmatmul.mubr.f32.gmra.mxu0 %v573_v35  ;;  %2427 = vmatprep.subr.mxu1 %v888_v36 }
  0x9a   : > { %2381 = vmatprep.mubr.f32.mxu0 %v574_v37  ;;  %2428 = vmatpush3.msra.mxu1 %v888_v36 }
  0x9b   : > { %2403 = vmatmul.mubr.f32.gmra.mxu1 %v589_v38  ;;  %2429 = vmatprep.subr.mxu1 %v887_v39 }
  0x9c   : > { %2405 = vmatprep.mubr.f32.mxu1 %v590_v40  ;;  %2430 = vmatpush3.msra.mxu1 %v887_v39 }
  0x9d   : > { %2382 = vmatmul.mubr.f32.gmra.mxu0 %v575_v41  ;;  %2431 = vmatprep.subr.mxu1 %v886_v42 }
  0x9e   : > { %2384 = vmatprep.mubr.f32.mxu0 %v576_v43  ;;  %2432 = vmatpush3.msra.mxu1 %v886_v42 }
  0x9f   : > { %2406 = vmatmul.mubr.f32.gmra.mxu1 %v591_v44  ;;  %2433 = vmatprep.subr.mxu1 %v885_v45 }
  0xa0   : > { %2408 = vmatprep.mubr.f32.mxu1 %v592_v46  ;;  %2434 = vmatpush3.msra.mxu1 %v885_v45 }
  0xa1   : > { %2385 = vmatmul.mubr.f32.gmra.mxu0 %v577_v47  ;;  %2435 = vmatprep.subr.mxu1 %v884_v48 }
  0xa2   : > { %2387 = vmatprep.mubr.f32.mxu0 %v578_v49  ;;  %2436 = vmatpush3.msra.mxu1 %v884_v48 }
  0xa3   : > { %2409 = vmatmul.mubr.f32.gmra.mxu1 %v593_v50  ;;  %2437 = vmatprep.subr.mxu1 %v883_v51 }
  0xa4   : > { %2411 = vmatprep.mubr.f32.mxu1 %v594_v52  ;;  %2438 = vmatpush3.msra.mxu1 %v883_v51 }
  0xa5   : > { %2388 = vmatmul.mubr.f32.gmra.mxu0 %v579_v53  ;;  %2439 = vmatprep.subr.mxu1 %v882_v54 }
  0xa6   : > { %2390 = vmatprep.mubr.f32.mxu0 %v580_v55  ;;  %2440 = vmatpush3.msra.mxu1 %v882_v54 }
  0xa7   : > { %2412 = vmatmul.mubr.f32.gmra.mxu1 %v595_v56  ;;  %2441 = vmatprep.subr.mxu1 %v881_v57 }
  0xa8   : > { %2414 = vmatprep.mubr.f32.mxu1 %v596_v58  ;;  %2442 = vmatpush3.msra.mxu1 %v881_v57 }
  0xa9   : > { %2391 = vmatmul.mubr.f32.gmra.mxu0 %v581_v59  ;;  %2443 = vmatprep.subr.mxu1 %v880_v61 }
  0xaa   : > { %2444 = vmatpush3.msra.mxu1 %v880_v61  ;;  %2497 = vmatprep.subr.mxu0 %v1173_v0 }
  0xab   : > { %2415 = vmatmul.mubr.f32.gmra.mxu1 %v597_v60  ;;  %2445 = vmatprep.subr.mxu1 %v879_v62 }
  0xac   : > { %2446 = vmatpush3.msra.mxu1 %v879_v62  ;;  %2498 = vmatpush3.msra.mxu0 %v1173_v0 }
  0xad   : > { %2447 = vmatprep.subr.mxu1 %v878_v63  ;;  %2499 = vmatprep.subr.mxu0 %v1172_v1 }
  0xae   : > { %2448 = vmatpush3.msra.mxu1 %v878_v63  ;;  %2500 = vmatpush3.msra.mxu0 %v1172_v1 }
  0xaf   : > { %2501 = vmatprep.subr.mxu0 %v1171_v2 }
  0xb0   : > { %2502 = vmatpush3.msra.mxu0 %v1171_v2 }
  0xb1   : > { %2503 = vmatprep.subr.mxu0 %v1170_v3 }
  0xb2   : > { %2504 = vmatpush3.msra.mxu0 %v1170_v3 }
  0xb3   : > { %2505 = vmatprep.subr.mxu0 %v1169_v4 }
  0xb4   : > { %2506 = vmatpush3.msra.mxu0 %v1169_v4 }
  0xb5   : > { %2507 = vmatprep.subr.mxu0 %v1168_v5 }
  0xb6   : > { %2508 = vmatpush3.msra.mxu0 %v1168_v5 }
  0xb7   : > { %2509 = vmatprep.subr.mxu0 %v1167_v6 }
  0xb8   : > { %2510 = vmatpush3.msra.mxu0 %v1167_v6 }
  0xb9   : > { %2511 = vmatprep.subr.mxu0 %v1166_v7 }
  0xba   : > { %2512 = vmatpush3.msra.mxu0 %v1166_v7 }
  0xbb   : > { %2513 = vmatprep.subr.mxu0 %v1165_v8 }
  0xbc   : > { %2514 = vmatpush3.msra.mxu0 %v1165_v8 }
  0xbd   : > { %2515 = vmatprep.subr.mxu0 %v1164_v9 }
  0xbe   : > { %2516 = vmatpush3.msra.mxu0 %v1164_v9 }
  0xbf   : > { %2517 = vmatprep.subr.mxu0 %v1163_v10 }
  0xc0   : > { %2518 = vmatpush3.msra.mxu0 %v1163_v10 }
  0xc1   : > { %2519 = vmatprep.subr.mxu0 %v1162_v11 }
  0xc2   : > { %2520 = vmatpush3.msra.mxu0 %v1162_v11 }
  0xc3   : > { %2521 = vmatprep.subr.mxu0 %v1161_v12 }
  0xc4   : > { %2522 = vmatpush3.msra.mxu0 %v1161_v12 }
 0x14d   : > { %v2371_v14 = vpop.f32.mrf.mxu0 }
 0x14e   : > { %v693_v15 = vadd.f32 %v2371_v14, %v3313_v13 }
 0x14f   : > { %v687_v16 = vpop.f32.mrf.mxu0  ;;  %v3316_v17 = vpop.f32.mrf.mxu1 }
 0x150   : > { %v688_v18 = vadd.f32 %v3313_v13, %v687_v16  ;;  %v847_v22 = vmax.f32 %v693_v15, 0.0  ;;  %v773_v8 = vadd.f32 %v3316_v17, %v3313_v13 }
 0x151   : > { %v2374_v19 = vpop.f32.mrf.mxu0  ;;  %v767_v20 = vpop.f32.mrf.mxu1 }
 0x152   : > { %v846_v21 = vmax.f32 %v688_v18, 0.0  ;;  %v703_v23 = vadd.f32 %v2374_v19, %v3313_v13  ;;  %v768_v3 = vadd.f32 %v3313_v13, %v767_v20  ;;  %v863_v14 = vmax.f32 %v773_v8, 0.0 }
 0x153   : > { %v697_v24 = vpop.f32.mrf.mxu0  ;;  %v3320_v25 = vpop.f32.mrf.mxu1 }
 0x154   : > { %v698_v26 = vadd.f32 %v3313_v13, %v697_v24  ;;  %2449 = vmatprep.mubr.f32.mxu1 %v846_v21  ;;  %v849_v31 = vmax.f32 %v703_v23, 0.0  ;;  %v862_v10 = vmax.f32 %v768_v3, 0.0  ;;  %v783_v15 = vadd.f32 %v3320_v25, %v3313_v13 }
 0x155   : > { %v2377_v27 = vpop.f32.mrf.mxu0  ;;  %2450 = vmatmul.mubr.f32.vlgmr.msra.gmra.mxu1 %v847_v22  ;;  %v777_v28 = vpop.f32.mrf.mxu1 }
 0x156   : > { %v848_v29 = vmax.f32 %v698_v26, 0.0  ;;  %v713_v30 = vadd.f32 %v2377_v27, %v3313_v13  ;;  %v778_v11 = vadd.f32 %v3313_v13, %v777_v28  ;;  %v865_v20 = vmax.f32 %v783_v15, 0.0 }
 0x157   : > { %v707_v32 = vpop.f32.mrf.mxu0  ;;  %v3324_v33 = vpop.f32.mrf.mxu1 }
 0x158   : > { %v708_v34 = vadd.f32 %v3313_v13, %v707_v32  ;;  %2452 = vmatprep.mubr.f32.mxu1 %v848_v29  ;;  %v851_v35 = vmax.f32 %v713_v30, 0.0  ;;  %v864_v16 = vmax.f32 %v778_v11, 0.0  ;;  %v793_v17 = vadd.f32 %v3324_v33, %v3313_v13 }
 0x159   : > { %v2380_v36 = vpop.f32.mrf.mxu0  ;;  %2453 = vmatmul.mubr.f32.gmra.mxu1 %v849_v31  ;;  %v787_v40 = vpop.f32.mrf.mxu1 }
 0x15a   : > { %v850_v37 = vmax.f32 %v708_v34, 0.0  ;;  %v723_v38 = vadd.f32 %v2380_v36, %v3313_v13  ;;  %v788_v18 = vadd.f32 %v3313_v13, %v787_v40  ;;  %v867_v24 = vmax.f32 %v793_v17, 0.0 }
 0x15b   : > { %v717_v39 = vpop.f32.mrf.mxu0  ;;  %v2404_v47 = vpop.f32.mrf.mxu1 }
 0x15c   : > { %v718_v41 = vadd.f32 %v3313_v13, %v717_v39  ;;  %2455 = vmatprep.mubr.f32.mxu1 %v850_v37  ;;  %v853_v42 = vmax.f32 %v723_v38, 0.0  ;;  %v866_v21 = vmax.f32 %v788_v18, 0.0  ;;  %v803_v26 = vadd.f32 %v2404_v47, %v3313_v13  ;;  %v1160_v47 = vld [vmem:[%s3222_s30 + $0x10] sm:$0xff] }
 0x15d   : > { %v2383_v43 = vpop.f32.mrf.mxu0  ;;  %2456 = vmatmul.mubr.f32.gmra.mxu1 %v851_v35  ;;  %v797_v54 = vpop.f32.mrf.mxu1  ;;  %2523 = vmatprep.subr.mxu0 %v1160_v47 }
 0x15e   : > { %v852_v44 = vmax.f32 %v718_v41, 0.0  ;;  %v733_v45 = vadd.f32 %v2383_v43, %v3313_v13  ;;  %v798_v22 = vadd.f32 %v3313_v13, %v797_v54  ;;  %v869_v29 = vmax.f32 %v803_v26, 0.0  ;;  %2524 = vmatpush3.msra.mxu0 %v1160_v47 }
 0x15f   : > { %v727_v46 = vpop.f32.mrf.mxu0  ;;  %v2407_v61 = vpop.f32.mrf.mxu1 }
 0x160   : > { %v728_v48 = vadd.f32 %v3313_v13, %v727_v46  ;;  %2458 = vmatprep.mubr.f32.mxu1 %v852_v44  ;;  %v855_v49 = vmax.f32 %v733_v45, 0.0  ;;  %v868_v25 = vmax.f32 %v798_v22, 0.0  ;;  %v813_v30 = vadd.f32 %v2407_v61, %v3313_v13 }
 0x161   : > { %v2386_v50 = vpop.f32.mrf.mxu0  ;;  %2459 = vmatmul.mubr.f32.gmra.mxu1 %v853_v42  ;;  %v807_v5 = vpop.f32.mrf.mxu1 }
 0x162   : > { %v854_v51 = vmax.f32 %v728_v48, 0.0  ;;  %v743_v52 = vadd.f32 %v2386_v50, %v3313_v13  ;;  %v808_v27 = vadd.f32 %v3313_v13, %v807_v5  ;;  %v871_v34 = vmax.f32 %v813_v30, 0.0  ;;  %v1159_v48 = vld [vmem:[%s3222_s30 + $0x8] sm:$0xff] }
 0x163   : > { %v737_v53 = vpop.f32.mrf.mxu0  ;;  %v2410_v12 = vpop.f32.mrf.mxu1  ;;  %2525 = vmatprep.subr.mxu0 %v1159_v48 }
 0x164   : > { %v738_v55 = vadd.f32 %v3313_v13, %v737_v53  ;;  %2461 = vmatprep.mubr.f32.mxu1 %v854_v51  ;;  %v857_v56 = vmax.f32 %v743_v52, 0.0  ;;  %v870_v31 = vmax.f32 %v808_v27, 0.0  ;;  %v823_v35 = vadd.f32 %v2410_v12, %v3313_v13  ;;  %2526 = vmatpush3.msra.mxu0 %v1159_v48 }
 0x165   : > { %v2389_v57 = vpop.f32.mrf.mxu0  ;;  %2462 = vmatmul.mubr.f32.gmra.mxu1 %v855_v49  ;;  %v817_v19 = vpop.f32.mrf.mxu1  ;;  %v1158_v49 = vld [vmem:[%s3222_s30] sm:$0xff]  ;;  %s4069_s30 = sld [smem:[#allocation28_spill]] }
 0x166   : > { %v856_v58 = vmax.f32 %v738_v55, 0.0  ;;  %v753_v59 = vadd.f32 %v2389_v57, %v3313_v13  ;;  %v818_v32 = vadd.f32 %v3313_v13, %v817_v19  ;;  %v873_v39 = vmax.f32 %v823_v35, 0.0  ;;  %2527 = vmatprep.subr.mxu0 %v1158_v49 }
 0x167   : > { %v747_v60 = vpop.f32.mrf.mxu0  ;;  %v2413_v23 = vpop.f32.mrf.mxu1  ;;  %2528 = vmatpush3.msra.mxu0 %v1158_v49 }
 0x168   : > { %v748_v62 = vadd.f32 %v3313_v13, %v747_v60  ;;  %2464 = vmatprep.mubr.f32.mxu1 %v856_v58  ;;  %v859_v63 = vmax.f32 %v753_v59, 0.0  ;;  %v872_v36 = vmax.f32 %v818_v32, 0.0  ;;  %v833_v40 = vadd.f32 %v2413_v23, %v3313_v13 }
 0x169   : > { %v2392_v0 = vpop.f32.mrf.mxu0  ;;  %2465 = vmatmul.mubr.f32.gmra.mxu1 %v857_v56  ;;  %v827_v28 = vpop.f32.mrf.mxu1 }
 0x16a   : > { %v858_v1 = vmax.f32 %v748_v62, 0.0  ;;  %v763_v2 = vadd.f32 %v2392_v0, %v3313_v13  ;;  %v828_v37 = vadd.f32 %v3313_v13, %v827_v28  ;;  %v875_v43 = vmax.f32 %v833_v40, 0.0 }
 0x16b   : > { %v757_v4 = vpop.f32.mrf.mxu0  ;;  %v2416_v33 = vpop.f32.mrf.mxu1  ;;  %s561_s27 = scalar_lea.vmem %s4069_s30, %s3307_s21  ;;  %s3821_s21 = scalar_lea.vmem [#allocation12], %s2172_s29 }
 0x16c   : > { %v758_v6 = vadd.f32 %v3313_v13, %v757_v4  ;;  %2467 = vmatprep.mubr.f32.mxu1 %v858_v1  ;;  %v861_v7 = vmax.f32 %v763_v2, 0.0  ;;  %v874_v41 = vmax.f32 %v828_v37, 0.0  ;;  %v843_v44 = vadd.f32 %v2416_v33, %v3313_v13  ;;  %s1957_s26 = sshll.u32 %s3821_s21, 4  ;;  %s3972_s26 = int_to_ptr.vmem [resolvable:$true] %s1957_s26 }
 0x16d   : > { %2468 = vmatmul.mubr.f32.gmra.mxu1 %v859_v63  ;;  %v837_v38 = vpop.f32.mrf.mxu1  ;;  %p2887_p13 = scmp.lt.s32.totalorder %s3972_s26, %s2885_s13 }
 0x16e   : > { %v860_v9 = vmax.f32 %v758_v6, 0.0  ;;  %v838_v42 = vadd.f32 %v3313_v13, %v837_v38  ;;  %v877_v46 = vmax.f32 %v843_v44, 0.0  ;;  %v3363_v13 = vld [vmem:[%s552_s9] ss:$0 sm:$0xff]  ;;  %s4071_s9 = sld [smem:[#allocation29_spill]] }
 0x170   : > { %2470 = vmatprep.mubr.f32.mxu1 %v860_v9  ;;  %v876_v45 = vmax.f32 %v838_v42, 0.0 }
 0x171   : > { %2471 = vmatmul.mubr.f32.gmra.mxu1 %v861_v7 }
 0x172   : > { %2473 = vmatprep.mubr.f32.mxu1 %v862_v10 }
 0x175   : > { %2474 = vmatmul.mubr.f32.gmra.mxu1 %v863_v14 }
 0x176   : > { %2476 = vmatprep.mubr.f32.mxu1 %v864_v16 }
 0x179   : > { %2477 = vmatmul.mubr.f32.gmra.mxu1 %v865_v20 }
 0x17a   : > { %2479 = vmatprep.mubr.f32.mxu1 %v866_v21 }
 0x17d   : > { %2480 = vmatmul.mubr.f32.gmra.mxu1 %v867_v24 }
 0x17e   : > { %2482 = vmatprep.mubr.f32.mxu1 %v868_v25 }
 0x181   : > { %2483 = vmatmul.mubr.f32.gmra.mxu1 %v869_v29 }
 0x182   : > { %2485 = vmatprep.mubr.f32.mxu1 %v870_v31 }
 0x185   : > { %2486 = vmatmul.mubr.f32.gmra.mxu1 %v871_v34 }
 0x186   : > { %2488 = vmatprep.mubr.f32.mxu1 %v872_v36 }
 0x189   : > { %2489 = vmatmul.mubr.f32.gmra.mxu1 %v873_v39 }
 0x18a   : > { %2491 = vmatprep.mubr.f32.mxu1 %v874_v41 }
 0x18d   : > { %2492 = vmatmul.mubr.f32.gmra.mxu1 %v875_v43 }
 0x18e   : > { %2494 = vmatprep.mubr.f32.mxu1 %v876_v45 }
 0x191   : > { %2495 = vmatmul.mubr.f32.gmra.mxu1 %v877_v46 }
 0x215   : > { %v2451_v50 = vpop.f32.mrf.mxu1 }
 0x216   : > { %v973_v51 = vadd.f32 %v2451_v50, %v3363_v13 }
 0x217   : > { %v967_v52 = vpop.f32.mrf.mxu1 }
 0x218   : > { %v968_v53 = vadd.f32 %v3363_v13, %v967_v52  ;;  %v1127_v56 = vmax.f32 %v973_v51, 0.0 }
 0x219   : > { %v2454_v54 = vpop.f32.mrf.mxu1 }
 0x21a   : > { %v1126_v55 = vmax.f32 %v968_v53, 0.0  ;;  %v983_v57 = vadd.f32 %v2454_v54, %v3363_v13 }
 0x21b   : > { %v977_v58 = vpop.f32.mrf.mxu1 }
 0x21c   : > { %v978_v59 = vadd.f32 %v3363_v13, %v977_v58  ;;  %2529 = vmatprep.mubr.f32.mxu0 %v1126_v55  ;;  %v1129_v62 = vmax.f32 %v983_v57, 0.0 }
 0x21d   : > { %v2457_v60 = vpop.f32.mrf.mxu1  ;;  %2530 = vmatmul.mubr.f32.vlgmr.msra.gmra.mxu0 %v1127_v56 }
 0x21e   : > { %v1128_v61 = vmax.f32 %v978_v59, 0.0  ;;  %v993_v63 = vadd.f32 %v2457_v60, %v3363_v13 }
 0x21f   : > { %v987_v0 = vpop.f32.mrf.mxu1 }
 0x220   : > { %v988_v1 = vadd.f32 %v3363_v13, %v987_v0  ;;  %2532 = vmatprep.mubr.f32.mxu0 %v1128_v61  ;;  %v1131_v4 = vmax.f32 %v993_v63, 0.0 }
 0x221   : > { %v2460_v2 = vpop.f32.mrf.mxu1  ;;  %2533 = vmatmul.mubr.f32.gmra.mxu0 %v1129_v62 }
 0x222   : > { %v1130_v3 = vmax.f32 %v988_v1, 0.0  ;;  %v1003_v5 = vadd.f32 %v2460_v2, %v3363_v13 }
 0x223   : > { %v997_v6 = vpop.f32.mrf.mxu1 }
 0x224   : > { %v998_v7 = vadd.f32 %v3363_v13, %v997_v6  ;;  %2535 = vmatprep.mubr.f32.mxu0 %v1130_v3  ;;  %v1133_v10 = vmax.f32 %v1003_v5, 0.0 }
 0x225   : > { %v2463_v8 = vpop.f32.mrf.mxu1  ;;  %2536 = vmatmul.mubr.f32.gmra.mxu0 %v1131_v4 }
 0x226   : > { %v1132_v9 = vmax.f32 %v998_v7, 0.0  ;;  %v1013_v11 = vadd.f32 %v2463_v8, %v3363_v13 }
 0x227   : > { %v1007_v12 = vpop.f32.mrf.mxu1 }
 0x228   : > { %v1008_v14 = vadd.f32 %v3363_v13, %v1007_v12  ;;  %2538 = vmatprep.mubr.f32.mxu0 %v1132_v9  ;;  %v1135_v18 = vmax.f32 %v1013_v11, 0.0 }
 0x229   : > { %v2466_v15 = vpop.f32.mrf.mxu1  ;;  %2539 = vmatmul.mubr.f32.gmra.mxu0 %v1133_v10 }
 0x22a   : > { %v1134_v16 = vmax.f32 %v1008_v14, 0.0  ;;  %v1023_v19 = vadd.f32 %v2466_v15, %v3363_v13 }
 0x22b   : > { %v1017_v20 = vpop.f32.mrf.mxu1 }
 0x22c   : > { %v1018_v17 = vadd.f32 %v3363_v13, %v1017_v20  ;;  %2541 = vmatprep.mubr.f32.mxu0 %v1134_v16  ;;  %v1137_v23 = vmax.f32 %v1023_v19, 0.0 }
 0x22d   : > { %v2469_v21 = vpop.f32.mrf.mxu1  ;;  %2542 = vmatmul.mubr.f32.gmra.mxu0 %v1135_v18 }
 0x22e   : > { %v1136_v22 = vmax.f32 %v1018_v17, 0.0  ;;  %v1033_v24 = vadd.f32 %v2469_v21, %v3363_v13  ;;  %v1413_v17 = vstv %s1412_s0  ;;  %s2880_s0 = scalar_lea.vmem %s3972_s26, 4096 }
 0x22f   : > { %v1027_v26 = vpop.f32.mrf.mxu1  ;;  %2694 = vrcp.f32 %v1413_v17  ;;  %p2881_p0 = scmp.ne.s32.totalorder %s3972_s26, %s2880_s0  ;;  %p2888_p12 = scmp.lt.s32.totalorder %s2886_s28, %s2880_s0 }
 0x230   : > { %v1028_v25 = vadd.f32 %v3363_v13, %v1027_v26  ;;  %2544 = vmatprep.mubr.f32.mxu0 %v1136_v22  ;;  %v1139_v29 = vmax.f32 %v1033_v24, 0.0  ;;  %v1406_v22 = vlaneseq  ;;  %v1408_v24 = vstv %s565_s18  ;;  %s3970_s18 = scalar_lea.hbm %s4071_s9, %s2192_s22 }
 0x231   : > { %v2472_v27 = vpop.f32.mrf.mxu1  ;;  %2545 = vmatmul.mubr.f32.gmra.mxu0 %v1137_v23  ;;  %p2882_p1 = pnand %p2881_p0, %p3096_p9  ;;  %p2889_p2 = por %p2888_p12, %p2887_p13 }
 0x232   : > { %v1138_v28 = vmax.f32 %v1028_v25, 0.0  ;;  %v1043_v30 = vadd.f32 %v2472_v27, %v3363_v13  ;;  %v1407_v23 = vand.u32 127, %v1406_v22  ;;  %v2979_v25 = vmov 0.0  }
 0x233   : > { %v1037_v31 = vpop.f32.mrf.mxu1  ;;  %p2883_p3 = pneg %p2882_p1 }
 0x234   : > { %v1038_v32 = vadd.f32 %v3363_v13, %v1037_v31  ;;  %2547 = vmatprep.mubr.f32.mxu0 %v1138_v28  ;;  %v1141_v35 = vmax.f32 %v1043_v30, 0.0  ;;  %vm1409_vm0 = vcmp.lt.s32.totalorder %v1407_v23, %v1408_v24 }
 0x235   : > { %v2475_v33 = vpop.f32.mrf.mxu1  ;;  %2548 = vmatmul.mubr.f32.gmra.mxu0 %v1139_v29  ;;  %v3404_v27 = vsel %vm1409_vm0, 1.0, %v2979_v25  ;;  %p2890_p4 = pnand %p2889_p2, %p2883_p3 }
 0x236   : > { %v1140_v34 = vmax.f32 %v1038_v32, 0.0  ;;  %v1053_v36 = vadd.f32 %v2475_v33, %v3363_v13 }
 0x237   : > { %v1047_v37 = vpop.f32.mrf.mxu1 }
 0x238   : > { %v1048_v38 = vadd.f32 %v3363_v13, %v1047_v37  ;;  %2550 = vmatprep.mubr.f32.mxu0 %v1140_v34  ;;  %v1143_v41 = vmax.f32 %v1053_v36, 0.0 }
 0x239   : > { %v2478_v39 = vpop.f32.mrf.mxu1  ;;  %2551 = vmatmul.mubr.f32.gmra.mxu0 %v1141_v35 }
 0x23a   : > { %v1142_v40 = vmax.f32 %v1048_v38, 0.0  ;;  %v1063_v42 = vadd.f32 %v2478_v39, %v3363_v13 }
 0x23b   : > { %v1057_v43 = vpop.f32.mrf.mxu1 }
 0x23c   : > { %v1058_v44 = vadd.f32 %v3363_v13, %v1057_v43  ;;  %2553 = vmatprep.mubr.f32.mxu0 %v1142_v40  ;;  %v1145_v47 = vmax.f32 %v1063_v42, 0.0  ;;  %v2695_v21 = vpop.eup %2694 }
 0x23d   : > { %v2481_v45 = vpop.f32.mrf.mxu1  ;;  %2554 = vmatmul.mubr.f32.gmra.mxu0 %v1143_v41  ;;  %2609 = vpush %v2695_v21 }
 0x23e   : > { %v1144_v46 = vmax.f32 %v1058_v44, 0.0  ;;  %v1073_v48 = vadd.f32 %v2481_v45, %v3363_v13 }
 0x23f   : > { %v1067_v49 = vpop.f32.mrf.mxu1 }
 0x240   : > { %v1068_v50 = vadd.f32 %v3363_v13, %v1067_v49  ;;  %2556 = vmatprep.mubr.f32.mxu0 %v1144_v46  ;;  %v1147_v53 = vmax.f32 %v1073_v48, 0.0 }
 0x241   : > { %v2484_v51 = vpop.f32.mrf.mxu1  ;;  %2557 = vmatmul.mubr.f32.gmra.mxu0 %v1145_v47 }
 0x242   : > { %v1146_v52 = vmax.f32 %v1068_v50, 0.0  ;;  %v1083_v54 = vadd.f32 %v2484_v51, %v3363_v13 }
 0x243   : > { %v1077_v55 = vpop.f32.mrf.mxu1 }
 0x244   : > { %v1078_v56 = vadd.f32 %v3363_v13, %v1077_v55  ;;  %2559 = vmatprep.mubr.f32.mxu0 %v1146_v52  ;;  %v1149_v59 = vmax.f32 %v1083_v54, 0.0 }
 0x245   : > { %v2487_v57 = vpop.f32.mrf.mxu1  ;;  %2560 = vmatmul.mubr.f32.gmra.mxu0 %v1147_v53 }
 0x246   : > { %v1148_v58 = vmax.f32 %v1078_v56, 0.0  ;;  %v1093_v60 = vadd.f32 %v2487_v57, %v3363_v13 }
 0x247   : > { %v1087_v61 = vpop.f32.mrf.mxu1 }
 0x248   : > { %v1088_v62 = vadd.f32 %v3363_v13, %v1087_v61  ;;  %2562 = vmatprep.mubr.f32.mxu0 %v1148_v58  ;;  %v1151_v1 = vmax.f32 %v1093_v60, 0.0 }
 0x249   : > { %v2490_v63 = vpop.f32.mrf.mxu1  ;;  %2563 = vmatmul.mubr.f32.gmra.mxu0 %v1149_v59 }
 0x24a   : > { %v1150_v0 = vmax.f32 %v1088_v62, 0.0  ;;  %v1103_v2 = vadd.f32 %v2490_v63, %v3363_v13 }
 0x24b   : > { %v1097_v3 = vpop.f32.mrf.mxu1 }
 0x24c   : > { %v1098_v4 = vadd.f32 %v3363_v13, %v1097_v3  ;;  %2565 = vmatprep.mubr.f32.mxu0 %v1150_v0  ;;  %v1153_v7 = vmax.f32 %v1103_v2, 0.0 }
 0x24d   : > { %v2493_v5 = vpop.f32.mrf.mxu1  ;;  %2566 = vmatmul.mubr.f32.gmra.mxu0 %v1151_v1 }
 0x24e   : > { %v1152_v6 = vmax.f32 %v1098_v4, 0.0  ;;  %v1113_v8 = vadd.f32 %v2493_v5, %v3363_v13 }
 0x24f   : > { %v1107_v9 = vpop.f32.mrf.mxu1 }
 0x250   : > { %v1108_v10 = vadd.f32 %v3363_v13, %v1107_v9  ;;  %2568 = vmatprep.mubr.f32.mxu0 %v1152_v6  ;;  %v1155_v14 = vmax.f32 %v1113_v8, 0.0 }
 0x251   : > { %v2496_v11 = vpop.f32.mrf.mxu1  ;;  %2569 = vmatmul.mubr.f32.gmra.mxu0 %v1153_v7 }
 0x252   : > { %v1154_v12 = vmax.f32 %v1108_v10, 0.0  ;;  %v1123_v15 = vadd.f32 %v2496_v11, %v3363_v13 }
 0x253   : > { %v1117_v16 = vpop.f32.mrf.mxu1 }
 0x254   : > { %v1118_v18 = vadd.f32 %v3363_v13, %v1117_v16  ;;  %2571 = vmatprep.mubr.f32.mxu0 %v1154_v12  ;;  %v1157_v20 = vmax.f32 %v1123_v15, 0.0  ;;  %v3402_v13 = vld [vmem:[%s555_s11] ss:$0 sm:$0xff] }
 0x255   : > { %2572 = vmatmul.mubr.f32.gmra.mxu0 %v1155_v14 }
 0x256   : > { %v1156_v19 = vmax.f32 %v1118_v18, 0.0 }
 0x258   : > { %2574 = vmatprep.mubr.f32.mxu0 %v1156_v19 }
 0x259   : > { %2575 = vmatmul.mubr.f32.gmra.mxu0 %v1157_v20 }
 0x26e   : > { %s2610_s14 = spop %2609 }
 0x2dd   : > { %v2531_v26 = vpop.f32.mrf.mxu0 }
 0x2de   : > { %v3407_v28 = vadd.f32 %v2531_v26, %v3402_v13 }
 0x2df   : > { %v1247_v29 = vpop.f32.mrf.mxu0 }
 0x2e0   : > { %v3410_v30 = vadd.f32 %v3402_v13, %v1247_v29  ;;  %v1417_v31 = vmul.f32 %v3404_v27, %v3407_v28 }
 0x2e1   : > { %v2534_v32 = vpop.f32.mrf.mxu0 }
 0x2e2   : > { %v3415_v33 = vadd.f32 %v2534_v32, %v3402_v13  ;;  %1450 = vadd.xlane.f32.xlu0 %v1417_v31  ;;  %v1416_v37 = vmul.f32 %v3404_v27, %v3410_v30 }
 0x2e3   : > { %v1257_v34 = vpop.f32.mrf.mxu0 }
 0x2e4   : > { %v3418_v35 = vadd.f32 %v3402_v13, %v1257_v34  ;;  %v1419_v36 = vmul.f32 %v3404_v27, %v3415_v33 }
 0x2e5   : > { %v2537_v38 = vpop.f32.mrf.mxu0 }
 0x2e6   : > { %1454 = vadd.xlane.f32.xlu1 %v1419_v36  ;;  %1448 = vadd.xlane.f32.xlu0 %v1416_v37  ;;  %v3425_v40 = vadd.f32 %v2537_v38, %v3402_v13  ;;  %v1418_v42 = vmul.f32 %v3404_v27, %v3418_v35 }
 0x2e7   : > { %v1267_v39 = vpop.f32.mrf.mxu0 }
 0x2e8   : > { %v3428_v41 = vadd.f32 %v3402_v13, %v1267_v39  ;;  %v1421_v48 = vmul.f32 %v3404_v27, %v3425_v40 }
 0x2e9   : > { %v2540_v43 = vpop.f32.mrf.mxu0 }
 0x2ea   : > { %1452 = vadd.xlane.f32.xlu1 %v1418_v42  ;;  %v1420_v44 = vmul.f32 %v3404_v27, %v3428_v41  ;;  %v3435_v46 = vadd.f32 %v2540_v43, %v3402_v13 }
 0x2eb   : > { %v1277_v45 = vpop.f32.mrf.mxu0 }
 0x2ec   : > { %v3438_v47 = vadd.f32 %v3402_v13, %v1277_v45  ;;  %1456 = vadd.xlane.f32.xlu0 %v1420_v44  ;;  %v1423_v54 = vmul.f32 %v3404_v27, %v3435_v46 }
 0x2ed   : > { %v2543_v49 = vpop.f32.mrf.mxu0 }
 0x2ee   : > { %1458 = vadd.xlane.f32.xlu1 %v1421_v48  ;;  %v1422_v50 = vmul.f32 %v3404_v27, %v3438_v47  ;;  %v3445_v52 = vadd.f32 %v2543_v49, %v3402_v13 }
 0x2ef   : > { %v1287_v51 = vpop.f32.mrf.mxu0 }
 0x2f0   : > { %v3448_v53 = vadd.f32 %v3402_v13, %v1287_v51  ;;  %1460 = vadd.xlane.f32.xlu0 %v1422_v50  ;;  %v1425_v60 = vmul.f32 %v3404_v27, %v3445_v52 }
 0x2f1   : > { %v2546_v55 = vpop.f32.mrf.mxu0 }
 0x2f2   : > { %1462 = vadd.xlane.f32.xlu1 %v1423_v54  ;;  %v1424_v56 = vmul.f32 %v3404_v27, %v3448_v53  ;;  %v3455_v58 = vadd.f32 %v2546_v55, %v3402_v13 }
 0x2f3   : > { %v1297_v57 = vpop.f32.mrf.mxu0 }
 0x2f4   : > { %v3458_v59 = vadd.f32 %v3402_v13, %v1297_v57  ;;  %1464 = vadd.xlane.f32.xlu0 %v1424_v56  ;;  %v1427_v2 = vmul.f32 %v3404_v27, %v3455_v58 }
 0x2f5   : > { %v2549_v61 = vpop.f32.mrf.mxu0 }
 0x2f6   : > { %1466 = vadd.xlane.f32.xlu1 %v1425_v60  ;;  %v1426_v62 = vmul.f32 %v3404_v27, %v3458_v59  ;;  %v3465_v0 = vadd.f32 %v2549_v61, %v3402_v13 }
 0x2f7   : > { %v1307_v63 = vpop.f32.mrf.mxu0 }
 0x2f8   : > { %v3468_v1 = vadd.f32 %v3402_v13, %v1307_v63  ;;  %1468 = vadd.xlane.f32.xlu0 %v1426_v62  ;;  %v1429_v8 = vmul.f32 %v3404_v27, %v3465_v0 }
 0x2f9   : > { %v2552_v3 = vpop.f32.mrf.mxu0 }
 0x2fa   : > { %1470 = vadd.xlane.f32.xlu1 %v1427_v2  ;;  %v1428_v4 = vmul.f32 %v3404_v27, %v3468_v1  ;;  %v3475_v6 = vadd.f32 %v2552_v3, %v3402_v13 }
 0x2fb   : > { %v1317_v5 = vpop.f32.mrf.mxu0 }
 0x2fc   : > { %v3478_v7 = vadd.f32 %v3402_v13, %v1317_v5  ;;  %1472 = vadd.xlane.f32.xlu0 %v1428_v4  ;;  %v1431_v15 = vmul.f32 %v3404_v27, %v3475_v6 }
 0x2fd   : > { %v2555_v9 = vpop.f32.mrf.mxu0 }
 0x2fe   : > { %1474 = vadd.xlane.f32.xlu1 %v1429_v8  ;;  %v1430_v10 = vmul.f32 %v3404_v27, %v3478_v7  ;;  %v3485_v12 = vadd.f32 %v2555_v9, %v3402_v13 }
 0x2ff   : > { %v1327_v11 = vpop.f32.mrf.mxu0 }
 0x300   : > { %v3488_v14 = vadd.f32 %v3402_v13, %v1327_v11  ;;  %1476 = vadd.xlane.f32.xlu0 %v1430_v10  ;;  %v1433_v21 = vmul.f32 %v3404_v27, %v3485_v12 }
 0x301   : > { %v2558_v16 = vpop.f32.mrf.mxu0 }
 0x302   : > { %1478 = vadd.xlane.f32.xlu1 %v1431_v15  ;;  %v1432_v18 = vmul.f32 %v3404_v27, %v3488_v14  ;;  %v3495_v20 = vadd.f32 %v2558_v16, %v3402_v13  ;;  %v3566_v16 = vstv %s2610_s14 }
 0x303   : > { %v1337_v19 = vpop.f32.mrf.mxu0 }
 0x304   : > { %v3498_v17 = vadd.f32 %v3402_v13, %v1337_v19  ;;  %1480 = vadd.xlane.f32.xlu0 %v1432_v18  ;;  %v1435_v29 = vmul.f32 %v3404_v27, %v3495_v20 }
 0x305   : > { %v2561_v22 = vpop.f32.mrf.mxu0 }
 0x306   : > { %1482 = vadd.xlane.f32.xlu1 %v1433_v21  ;;  %v1434_v23 = vmul.f32 %v3404_v27, %v3498_v17  ;;  %v3505_v26 = vadd.f32 %v2561_v22, %v3402_v13 }
 0x307   : > { %v1347_v24 = vpop.f32.mrf.mxu0 }
 0x308   : > { %v3508_v25 = vadd.f32 %v3402_v13, %v1347_v24  ;;  %1484 = vadd.xlane.f32.xlu0 %v1434_v23  ;;  %v1437_v38 = vmul.f32 %v3404_v27, %v3505_v26 }
 0x309   : > { %v2564_v31 = vpop.f32.mrf.mxu0 }
 0x30a   : > { %1486 = vadd.xlane.f32.xlu1 %v1435_v29  ;;  %v1436_v32 = vmul.f32 %v3404_v27, %v3508_v25  ;;  %v3515_v36 = vadd.f32 %v2564_v31, %v3402_v13 }
 0x30b   : > { %v1357_v34 = vpop.f32.mrf.mxu0 }
 0x30c   : > { %v3518_v37 = vadd.f32 %v3402_v13, %v1357_v34  ;;  %1488 = vadd.xlane.f32.xlu0 %v1436_v32  ;;  %v1439_v48 = vmul.f32 %v3404_v27, %v3515_v36 }
 0x30d   : > { %v2567_v39 = vpop.f32.mrf.mxu0 }
 0x30e   : > { %1490 = vadd.xlane.f32.xlu1 %v1437_v38  ;;  %v1438_v42 = vmul.f32 %v3404_v27, %v3518_v37  ;;  %v3525_v44 = vadd.f32 %v2567_v39, %v3402_v13 }
 0x30f   : > { %v1367_v43 = vpop.f32.mrf.mxu0 }
 0x310   : > { %v3528_v45 = vadd.f32 %v3402_v13, %v1367_v43  ;;  %1492 = vadd.xlane.f32.xlu0 %v1438_v42  ;;  %v1441_v56 = vmul.f32 %v3404_v27, %v3525_v44 }
 0x311   : > { %v2570_v49 = vpop.f32.mrf.mxu0 }
 0x312   : > { %1494 = vadd.xlane.f32.xlu1 %v1439_v48  ;;  %v1440_v50 = vmul.f32 %v3404_v27, %v3528_v45  ;;  %v3535_v54 = vadd.f32 %v2570_v49, %v3402_v13 }
 0x313   : > { %v1377_v51 = vpop.f32.mrf.mxu0 }
 0x314   : > { %v3538_v55 = vadd.f32 %v3402_v13, %v1377_v51  ;;  %1496 = vadd.xlane.f32.xlu0 %v1440_v50  ;;  %v1443_v2 = vmul.f32 %v3404_v27, %v3535_v54 }
 0x315   : > { %v2573_v57 = vpop.f32.mrf.mxu0 }
 0x316   : > { %1498 = vadd.xlane.f32.xlu1 %v1441_v56  ;;  %v1442_v60 = vmul.f32 %v3404_v27, %v3538_v55  ;;  %v3545_v62 = vadd.f32 %v2573_v57, %v3402_v13 }
 0x317   : > { %v1387_v61 = vpop.f32.mrf.mxu0 }
 0x318   : > { %v3548_v63 = vadd.f32 %v3402_v13, %v1387_v61  ;;  %1500 = vadd.xlane.f32.xlu0 %v1442_v60  ;;  %v1445_v10 = vmul.f32 %v3404_v27, %v3545_v62 }
 0x319   : > { %v2576_v3 = vpop.f32.mrf.mxu0 }
 0x31a   : > { %1502 = vadd.xlane.f32.xlu1 %v1443_v2  ;;  %v1444_v4 = vmul.f32 %v3404_v27, %v3548_v63  ;;  %v3555_v8 = vadd.f32 %v2576_v3, %v3402_v13 }
 0x31b   : > { %v1397_v5 = vpop.f32.mrf.mxu0 }
 0x31c   : > { %v3558_v9 = vadd.f32 %v3402_v13, %v1397_v5  ;;  %1504 = vadd.xlane.f32.xlu0 %v1444_v4  ;;  %v1447_v15 = vmul.f32 %v3404_v27, %v3555_v8 }
 0x31e   : > { %1506 = vadd.xlane.f32.xlu1 %v1445_v10  ;;  %v1446_v11 = vmul.f32 %v3404_v27, %v3558_v9 }
 0x320   : > { %1508 = vadd.xlane.f32.xlu0 %v1446_v11 }
 0x322   : > { %1510 = vadd.xlane.f32.xlu1 %v1447_v15 }
 0x36b   : > { %v1451_v18 = vpop.xlane.xlu0 %1450 }
 0x36c   : > { %v1514_v13 = vmul.f32 %v3566_v16, %v1451_v18 }
 0x36e   : > { %v1546_v19 = vsub.f32 %v3407_v28, %v1514_v13 }
 0x36f   : > { %v1455_v21 = vpop.xlane.xlu1 %1454  ;;  %v1449_v22 = vpop.xlane.xlu0 %1448 }
 0x370   : > { %v1516_v23 = vmul.f32 %v3566_v16, %v1455_v21  ;;  %v1513_v24 = vmul.f32 %v3566_v16, %v1449_v22  ;;  %v3573_v29 = vmul.f32 %v3404_v27, %v1546_v19 }
 0x372   : > { %v1548_v31 = vsub.f32 %v3415_v33, %v1516_v23  ;;  %v1545_v32 = vsub.f32 %v3410_v30, %v1513_v24  ;;  %v1610_v34 = vmul.f32 %v3573_v29, %v3573_v29 }
 0x373   : > { %v1453_v38 = vpop.xlane.xlu1 %1452 }
 0x374   : > { %v1515_v39 = vmul.f32 %v3566_v16, %v1453_v38  ;;  %1643 = vadd.xlane.f32.xlu1 %v1610_v34  ;;  %v3581_v28 = vmul.f32 %v3404_v27, %v1548_v31  ;;  %v3584_v42 = vmul.f32 %v3404_v27, %v1545_v32 }
 0x375   : > { %v1457_v43 = vpop.xlane.xlu0 %1456 }
 0x376   : > { %v1547_v48 = vsub.f32 %v3418_v35, %v1515_v39  ;;  %v1517_v33 = vmul.f32 %v3566_v16, %v1457_v43  ;;  %v1612_v30 = vmul.f32 %v3581_v28, %v3581_v28  ;;  %v1609_v49 = vmul.f32 %v3584_v42, %v3584_v42 }
 0x377   : > { %v1459_v50 = vpop.xlane.xlu1 %1458 }
 0x378   : > { %v1549_v51 = vsub.f32 %v3428_v41, %v1517_v33  ;;  %v1518_v56 = vmul.f32 %v3566_v16, %v1459_v50  ;;  %1647 = vadd.xlane.f32.xlu1 %v1612_v30  ;;  %1641 = vadd.xlane.f32.xlu0 %v1609_v49  ;;  %v3595_v57 = vmul.f32 %v3404_v27, %v1547_v48 }
 0x379   : > { %v1461_v60 = vpop.xlane.xlu0 %1460 }
 0x37a   : > { %v1550_v35 = vsub.f32 %v3425_v40, %v1518_v56  ;;  %v1519_v61 = vmul.f32 %v3566_v16, %v1461_v60  ;;  %v1611_v2 = vmul.f32 %v3595_v57, %v3595_v57  ;;  %v3602_v3 = vmul.f32 %v3404_v27, %v1549_v51 }
 0x37b   : > { %v1463_v4 = vpop.xlane.xlu1 %1462 }
 0x37c   : > { %v1551_v41 = vsub.f32 %v3438_v47, %v1519_v61  ;;  %v1520_v5 = vmul.f32 %v3566_v16, %v1463_v4  ;;  %1645 = vadd.xlane.f32.xlu0 %v1611_v2  ;;  %v3607_v10 = vmul.f32 %v3404_v27, %v1550_v35  ;;  %v1613_v40 = vmul.f32 %v3602_v3, %v3602_v3 }
 0x37d   : > { %v1465_v11 = vpop.xlane.xlu0 %1464 }
 0x37e   : > { %v1552_v15 = vsub.f32 %v3435_v46, %v1520_v5  ;;  %v1521_v18 = vmul.f32 %v3566_v16, %v1465_v11  ;;  %v1614_v13 = vmul.f32 %v3607_v10, %v3607_v10  ;;  %v3616_v19 = vmul.f32 %v3404_v27, %v1551_v41 }
 0x37f   : > { %v1467_v47 = vpop.xlane.xlu1 %1466 }
 0x380   : > { %v1553_v21 = vsub.f32 %v3448_v53, %v1521_v18  ;;  %v1522_v22 = vmul.f32 %v3566_v16, %v1467_v47  ;;  %1651 = vadd.xlane.f32.xlu1 %v1614_v13  ;;  %1649 = vadd.xlane.f32.xlu0 %v1613_v40  ;;  %v3621_v23 = vmul.f32 %v3404_v27, %v1552_v15 }
 0x381   : > { %v1469_v24 = vpop.xlane.xlu0 %1468  ;;  %v1615_v46 = vmul.f32 %v3616_v19, %v3616_v19 }
 0x382   : > { %v1554_v31 = vsub.f32 %v3445_v52, %v1522_v22  ;;  %v1523_v32 = vmul.f32 %v3566_v16, %v1469_v24  ;;  %v1616_v34 = vmul.f32 %v3621_v23, %v3621_v23  ;;  %v3630_v53 = vmul.f32 %v3404_v27, %v1553_v21 }
 0x383   : > { %v1471_v38 = vpop.xlane.xlu1 %1470 }
 0x384   : > { %v1555_v39 = vsub.f32 %v3458_v59, %v1523_v32  ;;  %v1524_v43 = vmul.f32 %v3566_v16, %v1471_v38  ;;  %1655 = vadd.xlane.f32.xlu1 %v1616_v34  ;;  %1653 = vadd.xlane.f32.xlu0 %v1615_v46  ;;  %v3635_v48 = vmul.f32 %v3404_v27, %v1554_v31 }
 0x385   : > { %v1473_v33 = vpop.xlane.xlu0 %1472  ;;  %v1617_v52 = vmul.f32 %v3630_v53, %v3630_v53 }
 0x386   : > { %v1556_v30 = vsub.f32 %v3455_v58, %v1524_v43  ;;  %v1525_v49 = vmul.f32 %v3566_v16, %v1473_v33  ;;  %v1618_v50 = vmul.f32 %v3635_v48, %v3635_v48  ;;  %v3644_v59 = vmul.f32 %v3404_v27, %v1555_v39 }
 0x387   : > { %v1475_v51 = vpop.xlane.xlu1 %1474 }
 0x388   : > { %v1557_v56 = vsub.f32 %v3468_v1, %v1525_v49  ;;  %v1526_v60 = vmul.f32 %v3566_v16, %v1475_v51  ;;  %1659 = vadd.xlane.f32.xlu1 %v1618_v50  ;;  %1657 = vadd.xlane.f32.xlu0 %v1617_v52  ;;  %v3649_v35 = vmul.f32 %v3404_v27, %v1556_v30 }
 0x389   : > { %v1477_v61 = vpop.xlane.xlu0 %1476  ;;  %v1619_v58 = vmul.f32 %v3644_v59, %v3644_v59 }
 0x38a   : > { %v1558_v2 = vsub.f32 %v3465_v0, %v1526_v60  ;;  %v1527_v4 = vmul.f32 %v3566_v16, %v1477_v61  ;;  %v1620_v41 = vmul.f32 %v3649_v35, %v3649_v35  ;;  %v3658_v1 = vmul.f32 %v3404_v27, %v1557_v56 }
 0x38b   : > { %v1479_v5 = vpop.xlane.xlu1 %1478 }
 0x38c   : > { %v1559_v11 = vsub.f32 %v3478_v7, %v1527_v4  ;;  %v1528_v40 = vmul.f32 %v3566_v16, %v1479_v5  ;;  %1663 = vadd.xlane.f32.xlu1 %v1620_v41  ;;  %1661 = vadd.xlane.f32.xlu0 %v1619_v58  ;;  %v3663_v15 = vmul.f32 %v3404_v27, %v1558_v2 }
 0x38d   : > { %v1481_v18 = vpop.xlane.xlu0 %1480  ;;  %v1621_v0 = vmul.f32 %v3658_v1, %v3658_v1 }
 0x38e   : > { %v1560_v13 = vsub.f32 %v3475_v6, %v1528_v40  ;;  %v1529_v47 = vmul.f32 %v3566_v16, %v1481_v18  ;;  %v1622_v21 = vmul.f32 %v3663_v15, %v3663_v15  ;;  %v3672_v7 = vmul.f32 %v3404_v27, %v1559_v11 }
 0x38f   : > { %v1483_v22 = vpop.xlane.xlu1 %1482 }
 0x390   : > { %v1561_v24 = vsub.f32 %v3488_v14, %v1529_v47  ;;  %v1530_v46 = vmul.f32 %v3566_v16, %v1483_v22  ;;  %1667 = vadd.xlane.f32.xlu1 %v1622_v21  ;;  %1665 = vadd.xlane.f32.xlu0 %v1621_v0  ;;  %v3677_v31 = vmul.f32 %v3404_v27, %v1560_v13 }
 0x391   : > { %v1485_v32 = vpop.xlane.xlu0 %1484  ;;  %v1623_v6 = vmul.f32 %v3672_v7, %v3672_v7 }
 0x392   : > { %v1562_v34 = vsub.f32 %v3485_v12, %v1530_v46  ;;  %v1531_v38 = vmul.f32 %v3566_v16, %v1485_v32  ;;  %v1624_v39 = vmul.f32 %v3677_v31, %v3677_v31  ;;  %v3686_v14 = vmul.f32 %v3404_v27, %v1561_v24 }
 0x393   : > { %v1487_v43 = vpop.xlane.xlu1 %1486 }
 0x394   : > { %v1563_v33 = vsub.f32 %v3498_v17, %v1531_v38  ;;  %v1532_v52 = vmul.f32 %v3566_v16, %v1487_v43  ;;  %1671 = vadd.xlane.f32.xlu1 %v1624_v39  ;;  %1669 = vadd.xlane.f32.xlu0 %v1623_v6  ;;  %v3691_v30 = vmul.f32 %v3404_v27, %v1562_v34 }
 0x395   : > { %v1489_v49 = vpop.xlane.xlu0 %1488  ;;  %v1625_v12 = vmul.f32 %v3686_v14, %v3686_v14 }
 0x396   : > { %v1564_v50 = vsub.f32 %v3495_v20, %v1532_v52  ;;  %v1533_v51 = vmul.f32 %v3566_v16, %v1489_v49  ;;  %v1626_v56 = vmul.f32 %v3691_v30, %v3691_v30  ;;  %v3700_v17 = vmul.f32 %v3404_v27, %v1563_v33 }
 0x397   : > { %v1491_v60 = vpop.xlane.xlu1 %1490 }
 0x398   : > { %v1565_v61 = vsub.f32 %v3508_v25, %v1533_v51  ;;  %v1534_v58 = vmul.f32 %v3566_v16, %v1491_v60  ;;  %1675 = vadd.xlane.f32.xlu1 %v1626_v56  ;;  %1673 = vadd.xlane.f32.xlu0 %v1625_v12  ;;  %v3705_v2 = vmul.f32 %v3404_v27, %v1564_v50 }
 0x399   : > { %v1493_v4 = vpop.xlane.xlu0 %1492  ;;  %v1627_v20 = vmul.f32 %v3700_v17, %v3700_v17 }
 0x39a   : > { %v1566_v41 = vsub.f32 %v3505_v26, %v1534_v58  ;;  %v1535_v5 = vmul.f32 %v3566_v16, %v1493_v4  ;;  %v1628_v11 = vmul.f32 %v3705_v2, %v3705_v2  ;;  %v3714_v25 = vmul.f32 %v3404_v27, %v1565_v61 }
 0x39b   : > { %v1495_v40 = vpop.xlane.xlu1 %1494 }
 0x39c   : > { %v1567_v18 = vsub.f32 %v3518_v37, %v1535_v5  ;;  %v1536_v0 = vmul.f32 %v3566_v16, %v1495_v40  ;;  %1679 = vadd.xlane.f32.xlu1 %v1628_v11  ;;  %1677 = vadd.xlane.f32.xlu0 %v1627_v20  ;;  %v3719_v13 = vmul.f32 %v3404_v27, %v1566_v41 }
 0x39d   : > { %v1497_v47 = vpop.xlane.xlu0 %1496  ;;  %v1629_v26 = vmul.f32 %v3714_v25, %v3714_v25 }
 0x39e   : > { %v1568_v21 = vsub.f32 %v3515_v36, %v1536_v0  ;;  %v1537_v22 = vmul.f32 %v3566_v16, %v1497_v47  ;;  %v1630_v24 = vmul.f32 %v3719_v13, %v3719_v13  ;;  %v3728_v37 = vmul.f32 %v3404_v27, %v1567_v18 }
 0x39f   : > { %v1499_v46 = vpop.xlane.xlu1 %1498 }
 0x3a0   : > { %v1569_v32 = vsub.f32 %v3528_v45, %v1537_v22  ;;  %v1538_v6 = vmul.f32 %v3566_v16, %v1499_v46  ;;  %1683 = vadd.xlane.f32.xlu1 %v1630_v24  ;;  %1681 = vadd.xlane.f32.xlu0 %v1629_v26  ;;  %v3733_v34 = vmul.f32 %v3404_v27, %v1568_v21 }
 0x3a1   : > { %v1501_v38 = vpop.xlane.xlu0 %1500  ;;  %v1631_v36 = vmul.f32 %v3728_v37, %v3728_v37 }
 0x3a2   : > { %v1570_v39 = vsub.f32 %v3525_v44, %v1538_v6  ;;  %v1539_v43 = vmul.f32 %v3566_v16, %v1501_v38  ;;  %v1632_v33 = vmul.f32 %v3733_v34, %v3733_v34  ;;  %v3742_v45 = vmul.f32 %v3404_v27, %v1569_v32 }
 0x3a3   : > { %v1503_v52 = vpop.xlane.xlu1 %1502 }
 0x3a4   : > { %v1571_v49 = vsub.f32 %v3538_v55, %v1539_v43  ;;  %v1540_v12 = vmul.f32 %v3566_v16, %v1503_v52  ;;  %1687 = vadd.xlane.f32.xlu1 %v1632_v33  ;;  %1685 = vadd.xlane.f32.xlu0 %v1631_v36  ;;  %v3747_v50 = vmul.f32 %v3404_v27, %v1570_v39 }
 0x3a5   : > { %v1505_v51 = vpop.xlane.xlu0 %1504  ;;  %v1633_v44 = vmul.f32 %v3742_v45, %v3742_v45 }
 0x3a6   : > { %v1572_v56 = vsub.f32 %v3535_v54, %v1540_v12  ;;  %v1541_v60 = vmul.f32 %v3566_v16, %v1505_v51  ;;  %v1634_v61 = vmul.f32 %v3747_v50, %v3747_v50  ;;  %v3756_v55 = vmul.f32 %v3404_v27, %v1571_v49 }
 0x3a7   : > { %v1507_v58 = vpop.xlane.xlu1 %1506 }
 0x3a8   : > { %v1573_v4 = vsub.f32 %v3548_v63, %v1541_v60  ;;  %v1542_v20 = vmul.f32 %v3566_v16, %v1507_v58  ;;  %1691 = vadd.xlane.f32.xlu1 %v1634_v61  ;;  %1689 = vadd.xlane.f32.xlu0 %v1633_v44  ;;  %v3761_v41 = vmul.f32 %v3404_v27, %v1572_v56 }
 0x3a9   : > { %v1509_v5 = vpop.xlane.xlu0 %1508  ;;  %v1635_v54 = vmul.f32 %v3756_v55, %v3756_v55 }
 0x3aa   : > { %v1574_v11 = vsub.f32 %v3545_v62, %v1542_v20  ;;  %v1543_v40 = vmul.f32 %v3566_v16, %v1509_v5  ;;  %v1636_v18 = vmul.f32 %v3761_v41, %v3761_v41  ;;  %v3770_v63 = vmul.f32 %v3404_v27, %v1573_v4 }
 0x3ab   : > { %v1511_v0 = vpop.xlane.xlu1 %1510 }
 0x3ac   : > { %v1575_v47 = vsub.f32 %v3558_v9, %v1543_v40  ;;  %v1544_v26 = vmul.f32 %v3566_v16, %v1511_v0  ;;  %1695 = vadd.xlane.f32.xlu1 %v1636_v18  ;;  %1693 = vadd.xlane.f32.xlu0 %v1635_v54  ;;  %v3775_v21 = vmul.f32 %v3404_v27, %v1574_v11  ;;  %v3808_v0 = vld [vmem:[%s558_s2] ss:$0 sm:$0xff] }
 0x3ad   : > { %v1637_v24 = vmul.f32 %v3770_v63, %v3770_v63 }
 0x3ae   : > { %v1576_v62 = vsub.f32 %v3555_v8, %v1544_v26  ;;  %v1638_v22 = vmul.f32 %v3775_v21, %v3775_v21  ;;  %v3783_v46 = vmul.f32 %v3404_v27, %v1575_v47 }
 0x3b0   : > { %1699 = vadd.xlane.f32.xlu1 %v1638_v22  ;;  %1697 = vadd.xlane.f32.xlu0 %v1637_v24  ;;  %v3786_v9 = vmul.f32 %v3404_v27, %v1576_v62  ;;  %v1639_v8 = vmul.f32 %v3783_v46, %v3783_v46  ;;  %v3811_v22 = vld [vmem:[%s561_s27] ss:$0 sm:$0xff] }
 0x3b2   : > { %v1640_v32 = vmul.f32 %v3786_v9, %v3786_v9 }
 0x3b4   : > { %1703 = vadd.xlane.f32.xlu1 %v1640_v32  ;;  %1701 = vadd.xlane.f32.xlu0 %v1639_v8 }
 0x3fd   : > { %v1644_v6 = vpop.xlane.xlu1 %1643 }
 0x3fe   : > { %v1706_v38 = vmul.f32 %v1644_v6, %v3566_v16 }
 0x400   : > { %v1738_v36 = vadd.f32 1e-05, %v1706_v38 }
 0x401   : > { %v1648_v39 = vpop.xlane.xlu1 %1647  ;;  %v1642_v43 = vpop.xlane.xlu0 %1641 }
 0x402   : > { %2696 = vrsqrt.f32 %v1738_v36  ;;  %v1708_v33 = vmul.f32 %v1648_v39, %v3566_v16  ;;  %v1705_v27 = vmul.f32 %v1642_v43, %v3566_v16 }
 0x404   : > { %v1740_v52 = vadd.f32 1e-05, %v1708_v33  ;;  %v1737_v49 = vadd.f32 1e-05, %v1705_v27 }
 0x405   : > { %v1646_v12 = vpop.xlane.xlu0 %1645 }
 0x406   : > { %2698 = vrsqrt.f32 %v1740_v52  ;;  %v1707_v51 = vmul.f32 %v1646_v12, %v3566_v16 }
 0x407   : > { %2700 = vrsqrt.f32 %v1737_v49 }
 0x408   : > { %v1739_v44 = vadd.f32 1e-05, %v1707_v51 }
 0x409   : > { %v1652_v56 = vpop.xlane.xlu1 %1651  ;;  %v1650_v60 = vpop.xlane.xlu0 %1649 }
 0x40a   : > { %2702 = vrsqrt.f32 %v1739_v44  ;;  %v1710_v61 = vmul.f32 %v1652_v56, %v3566_v16  ;;  %v1709_v58 = vmul.f32 %v1650_v60, %v3566_v16 }
 0x40c   : > { %v1742_v4 = vadd.f32 1e-05, %v1710_v61  ;;  %v1741_v20 = vadd.f32 1e-05, %v1709_v58 }
 0x40d   : > { %v1656_v5 = vpop.xlane.xlu1 %1655  ;;  %v1654_v54 = vpop.xlane.xlu0 %1653 }
 0x40e   : > { %2704 = vrsqrt.f32 %v1742_v4  ;;  %v1712_v11 = vmul.f32 %v1656_v5, %v3566_v16  ;;  %v1711_v40 = vmul.f32 %v1654_v54, %v3566_v16 }
 0x40f   : > { %v2697_v18 = vpop.eup %2696  ;;  %2706 = vrsqrt.f32 %v1741_v20 }
 0x410   : > { %v1802_v47 = vmul.f32 %v2697_v18, %v3573_v29  ;;  %v1744_v26 = vadd.f32 1e-05, %v1712_v11  ;;  %v1743_v62 = vadd.f32 1e-05, %v1711_v40 }
 0x411   : > { %v1660_v24 = vpop.xlane.xlu1 %1659  ;;  %v1658_v32 = vpop.xlane.xlu0 %1657 }
 0x412   : > { %v1840_v8 = vmul.f32 %v3808_v0, %v1802_v47  ;;  %2708 = vrsqrt.f32 %v1744_v26  ;;  %v1714_v6 = vmul.f32 %v1660_v24, %v3566_v16  ;;  %v1713_v38 = vmul.f32 %v1658_v32, %v3566_v16 }
 0x413   : > { %v2699_v36 = vpop.eup %2698  ;;  %2710 = vrsqrt.f32 %v1743_v62 }
 0x414   : > { %v2701_v39 = vpop.eup %2700  ;;  %v1878_v43 = vadd.f32 %v3811_v22, %v1840_v8  ;;  %v1804_v29 = vmul.f32 %v2699_v36, %v3581_v28  ;;  %v1746_v33 = vadd.f32 1e-05, %v1714_v6  ;;  %v1745_v27 = vadd.f32 1e-05, %v1713_v38 }
 0x415   : > { %v1801_v52 = vmul.f32 %v2701_v39, %v3584_v42  ;;  %v1664_v49 = vpop.xlane.xlu1 %1663  ;;  %v1662_v12 = vpop.xlane.xlu0 %1661 }
 0x416   : > { %1910 = vst [vmem:[%s3821_s21 + $0x8] sm:$0xff] %v1878_v43  ;;  %v1842_v51 = vmul.f32 %v3808_v0, %v1804_v29  ;;  %2712 = vrsqrt.f32 %v1746_v33  ;;  %v1716_v44 = vmul.f32 %v1664_v49, %v3566_v16  ;;  %v1715_v56 = vmul.f32 %v1662_v12, %v3566_v16 }
 0x417   : > { %v2703_v28 = vpop.eup %2702  ;;  %v1839_v60 = vmul.f32 %v3808_v0, %v1801_v52  ;;  %2714 = vrsqrt.f32 %v1745_v27 }
 0x418   : > { %v1880_v42 = vadd.f32 %v3811_v22, %v1842_v51  ;;  %v1803_v61 = vmul.f32 %v2703_v28, %v3595_v57  ;;  %v1748_v58 = vadd.f32 1e-05, %v1716_v44  ;;  %v1747_v4 = vadd.f32 1e-05, %v1715_v56 }
 0x419   : > { %v1877_v20 = vadd.f32 %v3811_v22, %v1839_v60  ;;  %v1668_v5 = vpop.xlane.xlu1 %1667  ;;  %v1666_v54 = vpop.xlane.xlu0 %1665 }
 0x41a   : > { %1912 = vst [vmem:[%s3821_s21 + $0x18] sm:$0xff] %v1880_v42  ;;  %v1841_v11 = vmul.f32 %v3808_v0, %v1803_v61  ;;  %2716 = vrsqrt.f32 %v1748_v58  ;;  %v1718_v40 = vmul.f32 %v1668_v5, %v3566_v16  ;;  %v1717_v18 = vmul.f32 %v1666_v54, %v3566_v16 }
 0x41b   : > { %v2705_v47 = vpop.eup %2704  ;;  %1909 = vst [vmem:[%s3821_s21] sm:$0xff] %v1877_v20  ;;  %2718 = vrsqrt.f32 %v1747_v4 }
 0x41c   : > { %v2707_v26 = vpop.eup %2706  ;;  %v1879_v57 = vadd.f32 %v3811_v22, %v1841_v11  ;;  %v1806_v62 = vmul.f32 %v2705_v47, %v3607_v10  ;;  %v1750_v24 = vadd.f32 1e-05, %v1718_v40  ;;  %v1749_v32 = vadd.f32 1e-05, %v1717_v18 }
 0x41d   : > { %v1805_v8 = vmul.f32 %v2707_v26, %v3602_v3  ;;  %v1672_v6 = vpop.xlane.xlu1 %1671  ;;  %v1670_v38 = vpop.xlane.xlu0 %1669 }
 0x41e   : > { %1911 = vst [vmem:[%s3821_s21 + $0x10] sm:$0xff] %v1879_v57  ;;  %v1844_v36 = vmul.f32 %v3808_v0, %v1806_v62  ;;  %2720 = vrsqrt.f32 %v1750_v24  ;;  %v1720_v39 = vmul.f32 %v1672_v6, %v3566_v16  ;;  %v1719_v43 = vmul.f32 %v1670_v38, %v3566_v16 }
 0x41f   : > { %v2709_v29 = vpop.eup %2708  ;;  %v1843_v33 = vmul.f32 %v3808_v0, %v1805_v8  ;;  %2722 = vrsqrt.f32 %v1749_v32 }
 0x420   : > { %v2711_v10 = vpop.eup %2710  ;;  %v1882_v27 = vadd.f32 %v3811_v22, %v1844_v36  ;;  %v1808_v3 = vmul.f32 %v2709_v29, %v3621_v23  ;;  %v1752_v52 = vadd.f32 1e-05, %v1720_v39  ;;  %v1751_v49 = vadd.f32 1e-05, %v1719_v43 }
 0x421   : > { %v1881_v12 = vadd.f32 %v3811_v22, %v1843_v33  ;;  %v1807_v51 = vmul.f32 %v2711_v10, %v3616_v19  ;;  %v1676_v44 = vpop.xlane.xlu1 %1675  ;;  %v1674_v56 = vpop.xlane.xlu0 %1673 }
 0x422   : > { %1914 = vst [vmem:[%s3821_s21 + $0x28] sm:$0xff] %v1882_v27  ;;  %v1846_v28 = vmul.f32 %v3808_v0, %v1808_v3  ;;  %2724 = vrsqrt.f32 %v1752_v52  ;;  %v1722_v60 = vmul.f32 %v1676_v44, %v3566_v16  ;;  %v1721_v42 = vmul.f32 %v1674_v56, %v3566_v16 }
 0x423   : > { %v2713_v61 = vpop.eup %2712  ;;  %1913 = vst [vmem:[%s3821_s21 + $0x20] sm:$0xff] %v1881_v12  ;;  %v1845_v23 = vmul.f32 %v3808_v0, %v1807_v51  ;;  %2726 = vrsqrt.f32 %v1751_v49 }
 0x424   : > { %v2715_v58 = vpop.eup %2714  ;;  %v1884_v19 = vadd.f32 %v3811_v22, %v1846_v28  ;;  %v1810_v4 = vmul.f32 %v2713_v61, %v3635_v48  ;;  %v1754_v20 = vadd.f32 1e-05, %v1722_v60  ;;  %v1753_v5 = vadd.f32 1e-05, %v1721_v42 }
 0x425   : > { %v1883_v54 = vadd.f32 %v3811_v22, %v1845_v23  ;;  %v1809_v11 = vmul.f32 %v2715_v58, %v3630_v53  ;;  %v1680_v40 = vpop.xlane.xlu1 %1679  ;;  %v1678_v18 = vpop.xlane.xlu0 %1677 }
 0x426   : > { %1916 = vst [vmem:[%s3821_s21 + $0x38] sm:$0xff] %v1884_v19  ;;  %v1848_v47 = vmul.f32 %v3808_v0, %v1810_v4  ;;  %2728 = vrsqrt.f32 %v1754_v20  ;;  %v1724_v26 = vmul.f32 %v1680_v40, %v3566_v16  ;;  %v1723_v57 = vmul.f32 %v1678_v18, %v3566_v16 }
 0x427   : > { %v2717_v62 = vpop.eup %2716  ;;  %1915 = vst [vmem:[%s3821_s21 + $0x30] sm:$0xff] %v1883_v54  ;;  %v1847_v48 = vmul.f32 %v3808_v0, %v1809_v11  ;;  %2730 = vrsqrt.f32 %v1753_v5 }
 0x428   : > { %v2719_v24 = vpop.eup %2718  ;;  %v1886_v53 = vadd.f32 %v3811_v22, %v1848_v47  ;;  %v1812_v32 = vmul.f32 %v2717_v62, %v3649_v35  ;;  %v1756_v8 = vadd.f32 1e-05, %v1724_v26  ;;  %v1755_v6 = vadd.f32 1e-05, %v1723_v57 }
 0x429   : > { %v1885_v38 = vadd.f32 %v3811_v22, %v1847_v48  ;;  %v1811_v36 = vmul.f32 %v2719_v24, %v3644_v59  ;;  %v1684_v39 = vpop.xlane.xlu1 %1683  ;;  %v1682_v43 = vpop.xlane.xlu0 %1681 }
 0x42a   : > { %1918 = vst [vmem:[%s3821_s21 + $0x48] sm:$0xff] %v1886_v53  ;;  %v1850_v29 = vmul.f32 %v3808_v0, %v1812_v32  ;;  %2732 = vrsqrt.f32 %v1756_v8  ;;  %v1726_v33 = vmul.f32 %v1684_v39, %v3566_v16  ;;  %v1725_v10 = vmul.f32 %v1682_v43, %v3566_v16 }
 0x42b   : > { %v2721_v27 = vpop.eup %2720  ;;  %1917 = vst [vmem:[%s3821_s21 + $0x40] sm:$0xff] %v1885_v38  ;;  %v1849_v35 = vmul.f32 %v3808_v0, %v1811_v36  ;;  %2734 = vrsqrt.f32 %v1755_v6 }
 0x42c   : > { %v2723_v3 = vpop.eup %2722  ;;  %v1888_v59 = vadd.f32 %v3811_v22, %v1850_v29  ;;  %v1814_v52 = vmul.f32 %v2721_v27, %v3663_v15  ;;  %v1758_v49 = vadd.f32 1e-05, %v1726_v33  ;;  %v1757_v12 = vadd.f32 1e-05, %v1725_v10 }
 0x42d   : > { %v1887_v51 = vadd.f32 %v3811_v22, %v1849_v35  ;;  %v1813_v44 = vmul.f32 %v2723_v3, %v3658_v1  ;;  %v1688_v56 = vpop.xlane.xlu1 %1687  ;;  %v1686_v28 = vpop.xlane.xlu0 %1685 }
 0x42e   : > { %1920 = vst [vmem:[%s3821_s21 + $0x58] sm:$0xff] %v1888_v59  ;;  %v1852_v60 = vmul.f32 %v3808_v0, %v1814_v52  ;;  %2736 = vrsqrt.f32 %v1758_v49  ;;  %v1728_v42 = vmul.f32 %v1688_v56, %v3566_v16  ;;  %v1727_v61 = vmul.f32 %v1686_v28, %v3566_v16 }
 0x42f   : > { %v2725_v23 = vpop.eup %2724  ;;  %1919 = vst [vmem:[%s3821_s21 + $0x50] sm:$0xff] %v1887_v51  ;;  %v1851_v15 = vmul.f32 %v3808_v0, %v1813_v44  ;;  %2738 = vrsqrt.f32 %v1757_v12 }
 0x430   : > { %v2727_v58 = vpop.eup %2726  ;;  %v1890_v1 = vadd.f32 %v3811_v22, %v1852_v60  ;;  %v1816_v19 = vmul.f32 %v2725_v23, %v3677_v31  ;;  %v1760_v4 = vadd.f32 1e-05, %v1728_v42  ;;  %v1759_v20 = vadd.f32 1e-05, %v1727_v61 }
 0x431   : > { %v1889_v5 = vadd.f32 %v3811_v22, %v1851_v15  ;;  %v1815_v54 = vmul.f32 %v2727_v58, %v3672_v7  ;;  %v1692_v11 = vpop.xlane.xlu1 %1691  ;;  %v1690_v40 = vpop.xlane.xlu0 %1689 }
 0x432   : > { %1922 = vst [vmem:[%s3821_s21 + $0x68] sm:$0xff] %v1890_v1  ;;  %v1854_v18 = vmul.f32 %v3808_v0, %v1816_v19  ;;  %2740 = vrsqrt.f32 %v1760_v4  ;;  %v1730_v47 = vmul.f32 %v1692_v11, %v3566_v16  ;;  %v1729_v26 = vmul.f32 %v1690_v40, %v3566_v16 }
 0x433   : > { %v2729_v57 = vpop.eup %2728  ;;  %1921 = vst [vmem:[%s3821_s21 + $0x60] sm:$0xff] %v1889_v5  ;;  %v1853_v31 = vmul.f32 %v3808_v0, %v1815_v54  ;;  %2742 = vrsqrt.f32 %v1759_v20 }
 0x434   : > { %v2731_v62 = vpop.eup %2730  ;;  %v1892_v7 = vadd.f32 %v3811_v22, %v1854_v18  ;;  %v1818_v48 = vmul.f32 %v2729_v57, %v3691_v30  ;;  %v1762_v24 = vadd.f32 1e-05, %v1730_v47  ;;  %v1761_v53 = vadd.f32 1e-05, %v1729_v26 }
 0x435   : > { %v1891_v32 = vadd.f32 %v3811_v22, %v1853_v31  ;;  %v1817_v8 = vmul.f32 %v2731_v62, %v3686_v14  ;;  %v1696_v6 = vpop.xlane.xlu1 %1695  ;;  %v1694_v38 = vpop.xlane.xlu0 %1693 }
 0x436   : > { %1924 = vst [vmem:[%s3821_s21 + $0x78] sm:$0xff] %v1892_v7  ;;  %v1856_v36 = vmul.f32 %v3808_v0, %v1818_v48  ;;  %2744 = vrsqrt.f32 %v1762_v24  ;;  %v1732_v39 = vmul.f32 %v1696_v6, %v3566_v16  ;;  %v1731_v43 = vmul.f32 %v1694_v38, %v3566_v16 }
 0x437   : > { %v2733_v29 = vpop.eup %2732  ;;  %1923 = vst [vmem:[%s3821_s21 + $0x70] sm:$0xff] %v1891_v32  ;;  %v1855_v30 = vmul.f32 %v3808_v0, %v1817_v8  ;;  %2746 = vrsqrt.f32 %v1761_v53 }
 0x438   : > { %v2735_v33 = vpop.eup %2734  ;;  %v1894_v14 = vadd.f32 %v3811_v22, %v1856_v36  ;;  %v1820_v10 = vmul.f32 %v2733_v29, %v3705_v2  ;;  %v1764_v27 = vadd.f32 1e-05, %v1732_v39  ;;  %v1763_v35 = vadd.f32 1e-05, %v1731_v43 }
 0x439   : > { %v1893_v3 = vadd.f32 %v3811_v22, %v1855_v30  ;;  %v1819_v59 = vmul.f32 %v2735_v33, %v3700_v17  ;;  %v1700_v52 = vpop.xlane.xlu1 %1699  ;;  %v1698_v49 = vpop.xlane.xlu0 %1697 }
 0x43a   : > { %1926 = vst [vmem:[%s3821_s21 + $0x88] sm:$0xff] %v1894_v14  ;;  %v1858_v12 = vmul.f32 %v3808_v0, %v1820_v10  ;;  %2748 = vrsqrt.f32 %v1764_v27  ;;  %v1734_v51 = vmul.f32 %v1700_v52, %v3566_v16  ;;  %v1733_v44 = vmul.f32 %v1698_v49, %v3566_v16 }
 0x43b   : > { %v2737_v56 = vpop.eup %2736  ;;  %1925 = vst [vmem:[%s3821_s21 + $0x80] sm:$0xff] %v1893_v3  ;;  %v1857_v2 = vmul.f32 %v3808_v0, %v1819_v59  ;;  %2750 = vrsqrt.f32 %v1763_v35 }
 0x43c   : > { %v2739_v28 = vpop.eup %2738  ;;  %v1896_v17 = vadd.f32 %v3811_v22, %v1858_v12  ;;  %v1822_v60 = vmul.f32 %v2737_v56, %v3719_v13  ;;  %v1766_v42 = vadd.f32 1e-05, %v1734_v51  ;;  %v1765_v61 = vadd.f32 1e-05, %v1733_v44 }
 0x43d   : > { %v1895_v23 = vadd.f32 %v3811_v22, %v1857_v2  ;;  %v1821_v15 = vmul.f32 %v2739_v28, %v3714_v25  ;;  %v1704_v58 = vpop.xlane.xlu1 %1703  ;;  %v1702_v1 = vpop.xlane.xlu0 %1701 }
 0x43e   : > { %1928 = vst [vmem:[%s3821_s21 + $0x98] sm:$0xff] %v1896_v17  ;;  %v1860_v19 = vmul.f32 %v3808_v0, %v1822_v60  ;;  %2752 = vrsqrt.f32 %v1766_v42  ;;  %v1736_v4 = vmul.f32 %v1704_v58, %v3566_v16  ;;  %v1735_v20 = vmul.f32 %v1702_v1, %v3566_v16 }
 0x43f   : > { %v2741_v5 = vpop.eup %2740  ;;  %1927 = vst [vmem:[%s3821_s21 + $0x90] sm:$0xff] %v1895_v23  ;;  %v1859_v13 = vmul.f32 %v3808_v0, %v1821_v15  ;;  %2754 = vrsqrt.f32 %v1765_v61 }
 0x440   : > { %v2743_v54 = vpop.eup %2742  ;;  %v1898_v25 = vadd.f32 %v3811_v22, %v1860_v19  ;;  %v1824_v11 = vmul.f32 %v2741_v5, %v3733_v34  ;;  %v1768_v40 = vadd.f32 1e-05, %v1736_v4  ;;  %v1767_v18 = vadd.f32 1e-05, %v1735_v20 }
 0x441   : > { %v1897_v47 = vadd.f32 %v3811_v22, %v1859_v13  ;;  %v1823_v26 = vmul.f32 %v2743_v54, %v3728_v37 }
 0x442   : > { %1930 = vst [vmem:[%s3821_s21 + $0xa8] sm:$0xff] %v1898_v25  ;;  %v1862_v16 = vmul.f32 %v3808_v0, %v1824_v11  ;;  %2756 = vrsqrt.f32 %v1768_v40 }
 0x443   : > { %v2745_v57 = vpop.eup %2744  ;;  %1929 = vst [vmem:[%s3821_s21 + $0xa0] sm:$0xff] %v1897_v47  ;;  %v1861_v31 = vmul.f32 %v3808_v0, %v1823_v26  ;;  %2758 = vrsqrt.f32 %v1767_v18 }
 0x444   : > { %v2747_v62 = vpop.eup %2746  ;;  %v1900_v34 = vadd.f32 %v3811_v22, %v1862_v16  ;;  %v1826_v7 = vmul.f32 %v2745_v57, %v3747_v50 }
 0x445   : > { %v1899_v48 = vadd.f32 %v3811_v22, %v1861_v31  ;;  %v1825_v37 = vmul.f32 %v2747_v62, %v3742_v45 }
 0x446   : > { %1932 = vst [vmem:[%s3821_s21 + $0xb8] sm:$0xff] %v1900_v34  ;;  %v1864_v24 = vmul.f32 %v3808_v0, %v1826_v7 }
 0x447   : > { %v2749_v53 = vpop.eup %2748  ;;  %1931 = vst [vmem:[%s3821_s21 + $0xb0] sm:$0xff] %v1899_v48  ;;  %v1863_v32 = vmul.f32 %v3808_v0, %v1825_v37 }
 0x448   : > { %v2751_v8 = vpop.eup %2750  ;;  %v1902_v6 = vadd.f32 %v3811_v22, %v1864_v24  ;;  %v1828_v38 = vmul.f32 %v2749_v53, %v3761_v41 }
 0x449   : > { %v1901_v50 = vadd.f32 %v3811_v22, %v1863_v32  ;;  %v1827_v36 = vmul.f32 %v2751_v8, %v3756_v55 }
 0x44a   : > { %1934 = vst [vmem:[%s3821_s21 + $0xc8] sm:$0xff] %v1902_v6  ;;  %v1866_v45 = vmul.f32 %v3808_v0, %v1828_v38 }
 0x44b   : > { %v2753_v39 = vpop.eup %2752  ;;  %1933 = vst [vmem:[%s3821_s21 + $0xc0] sm:$0xff] %v1901_v50  ;;  %v1865_v43 = vmul.f32 %v3808_v0, %v1827_v36 }
 0x44c   : > { %v2755_v29 = vpop.eup %2754  ;;  %v1904_v30 = vadd.f32 %v3811_v22, %v1866_v45  ;;  %v1830_v41 = vmul.f32 %v2753_v39, %v3775_v21 }
 0x44d   : > { %v1903_v33 = vadd.f32 %v3811_v22, %v1865_v43  ;;  %v1829_v55 = vmul.f32 %v2755_v29, %v3770_v63 }
 0x44e   : > { %1936 = vst [vmem:[%s3821_s21 + $0xd8] sm:$0xff] %v1904_v30  ;;  %v1868_v14 = vmul.f32 %v3808_v0, %v1830_v41 }
 0x44f   : > { %v2757_v10 = vpop.eup %2756  ;;  %1935 = vst [vmem:[%s3821_s21 + $0xd0] sm:$0xff] %v1903_v33  ;;  %v1867_v27 = vmul.f32 %v3808_v0, %v1829_v55 }
 0x450   : > { %v2759_v35 = vpop.eup %2758  ;;  %v1906_v3 = vadd.f32 %v3811_v22, %v1868_v14  ;;  %v1832_v21 = vmul.f32 %v2757_v10, %v3786_v9 }
 0x451   : > { %v1905_v59 = vadd.f32 %v3811_v22, %v1867_v27  ;;  %v1831_v52 = vmul.f32 %v2759_v35, %v3783_v46 }
 0x452   : > { %1938 = vst [vmem:[%s3821_s21 + $0xe8] sm:$0xff] %v1906_v3  ;;  %v1870_v63 = vmul.f32 %v3808_v0, %v1832_v21 }
 0x453   : > { %1937 = vst [vmem:[%s3821_s21 + $0xe0] sm:$0xff] %v1905_v59  ;;  %v1869_v49 = vmul.f32 %v3808_v0, %v1831_v52 }
 0x454   : > { %v1908_v12 = vadd.f32 %v3811_v22, %v1870_v63 }
 0x455   : > { %v1907_v46 = vadd.f32 %v3811_v22, %v1869_v49 }
 0x456   : > { %1940 = vst [vmem:[%s3821_s21 + $0xf8] sm:$0xff] %v1908_v12 }
 0x457   : > { %1939 = vst [vmem:[%s3821_s21 + $0xf0] sm:$0xff] %v1907_v46 }
 0x458   : > { %2893 = shalt.err (!%p2890_p4)
}
 0x459   : > { %s2894_s11 = scalar_lea.hbm %s3970_s18, 4096  ;;  %s2898_s15 = scalar_lea.hbm %s4071_s9, 8192 }
 0x45a   : > { %p2895_p5 = scmp.ne.s32.totalorder %s3970_s18, %s2894_s11  ;;  %p2899_p10 = scmp.lt.s32.totalorder %s3970_s18, %s4071_s9 }
 0x45b   : > { %p2900_p8 = scmp.lt.s32.totalorder %s2898_s15, %s2894_s11 }
 0x45c   : > { %p2896_p6 = pnand %p2895_p5, %p3096_p9 }
 0x45d   : > { %p2901_p0 = por %p2900_p8, %p2899_p10 }
 0x45e   : > { %p2897_p7 = pneg %p2896_p6 }
 0x460   : > { %p2902_p1 = pnand %p2901_p0, %p2897_p7 }
 0x462   : > { %2905 = shalt.err (!%p2902_p1)
}
 0x463   : > { %s2981_s8 = smov 128   ;;  %s2982_s16 = smov 8  }
 0x464   : > { %2619 = dma.vmem_to_hbm [thread:$0]  (%p3096_p9), %s3972_s26, 4096, %s3970_s18, %s1942_s19, %s2981_s8, %s2981_s8, %s2982_s16  }
 0x465 PF: > { %s4072_s30 = sld [smem:[#allocation18_spill]]  ;;  %p4074_p3 = scmp.ge.s32.totalorder %s2970_s20, 2 }
 0x467   : > { %p2635_p13 = pnand %p4074_p3, %p3103_p11 }
 0x469   : > { %p2636_p12 = pneg %p2635_p13 }
 0x46b   : > { %s1972_s21 = sand.u32 1, %s4072_s30  }
 0x46c   : > { %s1973_s22 = scalar_lea.sflag [#allocation6], %s1972_s21 }
 0x46d   : > { %2945 = dma.done.wait (%p2636_p12), %s1973_s22, 4096  }
 0x46e   : > { %2947 = vsyncadd (%p2636_p12), %s1973_s22, 4294963200  ;;  %s36_s20 = sadd.s32 1, %s2970_s20   ;;  %s4075_s24 = sld [smem:[#allocation19_spill]] }
 0x46f   : > { %p33_p2 = scmp.ge.s32.totalorder %s36_s20, 4   ;;  %s4076_s18 = sld [smem:[#allocation23_spill]] }
 0x470   : > { %s4077_s19 = sld [smem:[#allocation20_spill]]  ;;  %s4079_s16 = smov %s2954_s17 }
 0x471   : > { %s4078_s0 = sld [smem:[#allocation21_spill]]  ;;  %35 = sbr.rel (!%p33_p2) target bundleno = 20 (0x14), region = 153 }
 0x474   : > { %s4080_s17 = smov %s4075_s24 }
 0x476   :  { %1978 = vsyncpa [#allocation5], 1 }
 0x477   :  { %1980 = vsyncpa [#allocation5 + $0x1], 1 }
 0x478   :  { %1981 = vsyncpa [#allocation8], 1 }
 0x479   :  { %1983 = vsyncpa [#allocation8 + $0x1], 1 }
 0x47a   :  { %1984 = vsyncpa [#allocation11], 1 }
 0x47b   :  { %1986 = vsyncpa [#allocation11 + $0x1], 1 }
 0x47c   :  { %1987 = vsyncpa [#allocation6], 1 }
 0x47d   :  { %1989 = vsyncpa [#allocation6 + $0x1], 1 }

</bundles_post_ra>
